<compile_context>
chip_gen: v5e
topology: v5e:2x2
jax: 0.10.0
libtpu: 0.0.40
codegen_flags: <defaults>
</compile_context>

<pallas_src>
import functools

import jax
import jax.numpy as jnp
import numpy as np
from jax import lax
from jax.experimental import pallas as pl
from jax.experimental.pallas import tpu as pltpu


# ---------------------------------------------------------------------------
# Pallas kernel: fused conv3x3 -> (+bias, +time-emb) -> SiLU -> conv3x3 -> +bias
# Everything channel-major: (channels, pixels) with pixels on the lane axis.
# ---------------------------------------------------------------------------
def _score_net_kernel(x_ref, s_ref, maskm_ref, emb_ref, sel_ref,
                      w1x_ref, w1s_ref, b1_ref, w2_ref, b2_ref, o_ref,
                      *, bblk, W, HW):

    def im2col(a, masks):
        # a: (C, N) f32, masks: (9, N) f32 -> (9*C, N) f32.
        # Conv taps as lane rotations (XLU, free slot vs VPU) + edge masks;
        # wrapped reads only occur at masked (zeroed) positions.
        n = a.shape[-1]
        taps = []
        t = 0
        for dy in (-1, 0, 1):
            for dx in (-1, 0, 1):
                delta = dy * W + dx
                shifted = a if delta == 0 else pltpu.roll(
                    a, shift=(-delta) % n, axis=1)
                taps.append(shifted * masks[t:t + 1, :])
                t += 1
        return jnp.concatenate(taps, axis=0)

    masks_m = maskm_ref[...]                                   # (9, Mblk)
    masks_hw = masks_m[:, :HW]                                 # (9, HW)

    # --- conv1, batch-independent part: condition + forcing channels -------
    s_patches = im2col(s_ref[...], masks_hw).astype(jnp.bfloat16)   # (9*Csp, HW)
    h_static = jnp.dot(w1s_ref[...], s_patches,
                       preferred_element_type=jnp.float32)          # (Chid, HW)
    h_static = h_static + b1_ref[...]
    if bblk > 1:
        h_static = jnp.concatenate([h_static] * bblk, axis=-1)      # (Chid, Mblk)

    # --- conv1, batch-dependent part: state channels of this batch block ---
    x_patches = im2col(x_ref[...], masks_m).astype(jnp.bfloat16)    # (9*Cxp, Mblk)
    h_x = jnp.dot(w1x_ref[...], x_patches,
                  preferred_element_type=jnp.float32)               # (Chid, Mblk)

    # --- time embedding: (Chid, bblk) expanded over pixels via a 0/1 matrix
    emb_blk = emb_ref[0]                                            # (Chid, bblk)
    if bblk == 1:
        emb_bc = emb_blk * sel_ref[...]                             # (Chid, Mblk)
    else:
        emb_bc = jnp.dot(emb_blk, sel_ref[...],
                         preferred_element_type=jnp.float32)        # (Chid, Mblk)

    h = jax.nn.silu(h_x + h_static + emb_bc)                        # (Chid, Mblk)

    # --- conv2: single fat im2col matmul, lane-dense output -----------------
    h_patches = im2col(h, masks_m).astype(jnp.bfloat16)             # (9*Chid, Mblk)
    out = jnp.dot(w2_ref[...], h_patches,
                  preferred_element_type=jnp.float32) + b2_ref[...]  # (Cout, Mblk)
    o_ref[...] = out


def _pick_batch_block(batch, hw, chid):
    # Cap the batch block so the conv2 im2col buffer (9*Chid, Bblk*H*W) f32
    # stays a few MiB (comfortable for scoped VMEM on v5e/v6e/v7x).  A block
    # is only legal if its pixel extent is lane-aligned (multiple of 128) or
    # it covers the whole batch (block == full array dims).
    budget = 4 * 1024 * 1024
    cap = max(1, budget // (9 * chid * hw * 4))
    valid = [d for d in range(1, batch + 1)
             if batch % d == 0 and ((d * hw) % 128 == 0 or d == batch)]
    under = [d for d in valid if d <= cap] or [min(valid)]
    bblk = max(under)
    # Keep >=2 grid blocks when possible so both v7x TensorCores get work
    # (near-zero cost on the single-TC v5e/v6e parts).
    if batch // bblk < 2:
        smaller = [d for d in under if batch // d >= 2]
        if smaller:
            bblk = max(smaller)
    return bblk


def _round_up8(n):
    return -(-n // 8) * 8


# ---------------------------------------------------------------------------
# AmortizedSpecialScoreUNet forward (NCHW in/out, like PyTorch)
# ---------------------------------------------------------------------------
def amortized_special_score_unet_forward(x, t, condition, params, *, size,
                                         in_features, out_features, hidden,
                                         use_pallas=True):
    # x: (B, out_features, H, W), t: (B,), condition: (1, in_features, *, *)
    B = x.shape[0]
    H = W = size
    HW = H * W
    Chid = hidden
    Cout = out_features + 1                       # forcing channel appended

    # registered buffer: forcing[y, x] = sin(4 * domain[x])
    domain = 2.0 * jnp.pi / size * (jnp.arange(size, dtype=jnp.float32) + 0.5)
    forcing_row = jnp.sin(4.0 * domain)                           # (W,)

    # tiny time-embedding MLP hoisted to plain JAX
    tv = t.reshape(B, 1).astype(jnp.float32)
    e = jax.nn.silu(tv * params["wt1"] + params["bt1"])           # (B, Chid)
    emb = e @ params["wt2"] + params["bt2"]                       # (B, Chid)

    if not use_pallas:
        # ----- pure-JAX reference path (same bf16-matmul / f32-accum math) --
        forcing_img = jnp.broadcast_to(forcing_row, (size, size))
        f = jnp.broadcast_to(forcing_img, (B, 1, H, W))
        cond = jnp.broadcast_to(condition, (B, in_features, H, W))
        y = jnp.concatenate([cond, x, f], axis=1)                 # (B, Cin, H, W)
        y_nhwc = jnp.transpose(y, (0, 2, 3, 1))
        dn = ("NHWC", "HWIO", "NHWC")
        w1b = params["w1"].astype(jnp.bfloat16)
        w2b = params["w2"].astype(jnp.bfloat16)
        h = lax.conv_general_dilated(
            y_nhwc.astype(jnp.bfloat16), w1b, (1, 1), "SAME",
            dimension_numbers=dn, preferred_element_type=jnp.float32)
        h = jax.nn.silu(h + params["b1"].reshape(1, 1, 1, -1)
                        + emb[:, None, None, :])
        o = lax.conv_general_dilated(
            h.astype(jnp.bfloat16), w2b, (1, 1), "SAME",
            dimension_numbers=dn, preferred_element_type=jnp.float32)
        o = o + params["b2"].reshape(1, 1, 1, -1)
        out = jnp.transpose(o, (0, 3, 1, 2))                      # (B, Cout, H, W)
        return out[:, :out_features]                              # drop forcing ch.

    # ---------------------------- Pallas path ------------------------------
    # static (batch-independent) input channels: [condition..., forcing]
    Csp = _round_up8(in_features + 1)
    cond_cm = jnp.broadcast_to(condition, (1, in_features, H, W))[0]
    cond_cm = cond_cm.reshape(in_features, HW).astype(jnp.float32)
    forc_cm = jnp.tile(forcing_row, (H,)).reshape(1, HW)
    s_cm = jnp.concatenate([cond_cm, forc_cm], axis=0)
    s_cm = jnp.pad(s_cm, ((0, Csp - (in_features + 1)), (0, 0)))

    # batch-dependent channels (state x), channel-major, padded to x8 rows
    Cxp = _round_up8(out_features)
    x_cm = jnp.transpose(x, (1, 0, 2, 3)).reshape(out_features, B * HW)
    x_cm = jnp.pad(x_cm.astype(jnp.float32), ((0, Cxp - out_features), (0, 0)))

    # batch / grid blocking
    bblk = _pick_batch_block(B, HW, Chid)
    nblocks = B // bblk
    mblk = bblk * HW

    # tap validity masks (9, HW) for a 'SAME' 3x3 conv, pre-tiled to the block
    yy, xx = jnp.meshgrid(jnp.arange(H), jnp.arange(W), indexing="ij")
    rows = []
    for dy in (-1, 0, 1):
        for dx in (-1, 0, 1):
            ok = ((yy + dy >= 0) & (yy + dy < H)
                  & (xx + dx >= 0) & (xx + dx < W))
            rows.append(ok.reshape(HW))
    mask9 = jnp.stack(rows, axis=0).astype(jnp.float32)           # (9, HW)
    mask9_m = jnp.tile(mask9, (1, bblk))                          # (9, Mblk)

    # per-grid-block time embedding (Chid, bblk), and the constant 0/1
    # block-expansion matrix (bblk, Mblk): sel[i, i*HW:(i+1)*HW] = 1.
    emb_cm = emb.T.astype(jnp.float32)                            # (Chid, B)
    emb3 = emb_cm.reshape(Chid, nblocks, bblk).transpose(1, 0, 2)  # (nb,Chid,bblk)
    sel_local = jnp.repeat(jnp.eye(bblk, dtype=jnp.float32), HW, axis=1)

    # weights: channel-major, im2col-flattened, bf16 for the MXU
    w1 = params["w1"]                                             # (3,3,Cin,Chid)
    w1_x = w1[:, :, in_features:in_features + out_features, :]
    w1_s = jnp.concatenate([w1[:, :, :in_features, :], w1[:, :, -1:, :]], axis=2)
    w1_x = jnp.pad(w1_x, ((0, 0), (0, 0), (0, Cxp - out_features), (0, 0)))
    w1_s = jnp.pad(w1_s, ((0, 0), (0, 0), (0, Csp - (in_features + 1)), (0, 0)))
    w1x_cm = w1_x.reshape(9 * Cxp, Chid).T.astype(jnp.bfloat16)   # (Chid, 9*Cxp)
    w1s_cm = w1_s.reshape(9 * Csp, Chid).T.astype(jnp.bfloat16)   # (Chid, 9*Csp)
    w2_cm = params["w2"].reshape(9 * Chid, Cout).T.astype(jnp.bfloat16)
    b1_col = params["b1"].reshape(Chid, 1).astype(jnp.float32)
    b2_col = params["b2"].reshape(Cout, 1).astype(jnp.float32)

    kernel = functools.partial(_score_net_kernel, bblk=bblk, W=W, HW=HW)

    def full2(shape):
        return pl.BlockSpec(shape, lambda b: (0, 0))

    out_cm = pl.pallas_call(
        kernel,
        out_shape=jax.ShapeDtypeStruct((Cout, B * HW), jnp.float32),
        grid=(nblocks,),
        in_specs=[
            pl.BlockSpec((Cxp, mblk), lambda b: (0, b)),           # x (state)
            full2((Csp, HW)),                                      # cond+forcing
            full2((9, mblk)),                                      # conv edge masks
            pl.BlockSpec((1, Chid, bblk), lambda b: (b, 0, 0)),    # time emb block
            full2((bblk, mblk)),                                   # 0/1 expansion
            full2((Chid, 9 * Cxp)),                                # w1 (x slice)
            full2((Chid, 9 * Csp)),                                # w1 (cond+forcing)
            full2((Chid, 1)),                                      # b1
            full2((Cout, 9 * Chid)),                               # w2
            full2((Cout, 1)),                                      # b2
        ],
        out_specs=pl.BlockSpec((Cout, mblk), lambda b: (0, b)),
        compiler_params=pltpu.CompilerParams(
            dimension_semantics=("parallel",),
            vmem_limit_bytes=32 * 1024 * 1024),
    )(x_cm, s_cm, mask9_m, emb3, sel_local,
      w1x_cm, w1s_cm, b1_col, w2_cm, b2_col)

    # lane-dense (Cout, B*H*W) -> NCHW; then drop the forcing channel.
    out = jnp.transpose(out_cm.reshape(Cout, B, H, W), (1, 0, 2, 3))
    return out[:, :out_features]


def init_params(key, Cin, Chid, Cout):
    ks = jax.random.split(key, 8)
    s1 = 1.0 / np.sqrt(9 * Cin)
    s2 = 1.0 / np.sqrt(9 * Chid)
    return dict(
        w1=jax.random.normal(ks[0], (3, 3, Cin, Chid), jnp.float32) * s1,
        b1=jax.random.normal(ks[1], (1, Chid), jnp.float32) * 0.02,
        wt1=jax.random.normal(ks[2], (1, Chid), jnp.float32),
        bt1=jax.random.normal(ks[3], (1, Chid), jnp.float32) * 0.02,
        wt2=jax.random.normal(ks[4], (Chid, Chid), jnp.float32) / np.sqrt(Chid),
        bt2=jax.random.normal(ks[5], (1, Chid), jnp.float32) * 0.02,
        w2=jax.random.normal(ks[6], (3, 3, Chid, Cout), jnp.float32) * s2,
        b2=jax.random.normal(ks[7], (1, Cout), jnp.float32) * 0.02,
    )


if __name__ == "__main__":
    B, in_features, out_features, size, hidden = 2, 4, 4, 16, 32
    Cin = in_features + out_features + 1      # condition + state + forcing
    Cout = out_features + 1                   # forcing channel appended

    key = jax.random.PRNGKey(0)
    kx, kt, kc, kp = jax.random.split(key, 4)
    x = jax.random.normal(kx, (B, out_features, size, size), jnp.float32)
    t = jax.random.uniform(kt, (B,), jnp.float32)
    condition = jax.random.normal(kc, (1, in_features, size, size), jnp.float32)
    params = init_params(kp, Cin, hidden, Cout)

    out = amortized_special_score_unet_forward(
        x, t, condition, params, size=size, in_features=in_features,
        out_features=out_features, hidden=hidden, use_pallas=True)
    out = jax.block_until_ready(out)
    assert out.shape == (B, out_features, size, size), out.shape

    ref = amortized_special_score_unet_forward(
        x, t, condition, params, size=size, in_features=in_features,
        out_features=out_features, hidden=hidden, use_pallas=False)
    ref = jax.block_until_ready(ref)

    # bf16 matmul operands (f32 accumulation) in both paths -> modest tolerance.
    if not np.allclose(np.asarray(out), np.asarray(ref), atol=2e-2, rtol=2e-2):
        raise AssertionError("Pallas kernel disagrees with JAX reference")

    print("KERNEL_OK")
</pallas_src>

<mosaic_0001>
module attributes {stable_mosaic.version = 11 : i64} {
  func.func @_score_net_kernel(%arg0: i32, %arg1: memref<8x256xf32, #tpu.memory_space<vmem>>, %arg2: memref<8x256xf32, #tpu.memory_space<vmem>>, %arg3: memref<9x256xf32, #tpu.memory_space<vmem>>, %arg4: memref<1x32x1xf32, #tpu.memory_space<vmem>>, %arg5: memref<1x256xf32, #tpu.memory_space<vmem>>, %arg6: memref<32x72xbf16, #tpu.memory_space<vmem>>, %arg7: memref<32x72xbf16, #tpu.memory_space<vmem>>, %arg8: memref<32x1xf32, #tpu.memory_space<vmem>>, %arg9: memref<5x288xbf16, #tpu.memory_space<vmem>>, %arg10: memref<5x1xf32, #tpu.memory_space<vmem>>, %arg11: memref<5x256xf32, #tpu.memory_space<vmem>>) attributes {dimension_semantics = [#tpu.dimension_semantics<parallel>], iteration_bounds = array<i64: 2>, scalar_prefetch = 0 : i64, scratch_operands = 0 : i64, tpu.core_type = #tpu.core_type<tc>, window_params = [{transform_indices = @transform_0, window_bounds = array<i64: 8, 256>}, {pipeline_mode = #tpu.pipeline_mode<synchronous>, transform_indices = @transform_1, window_bounds = array<i64: 8, 256>}, {pipeline_mode = #tpu.pipeline_mode<synchronous>, transform_indices = @transform_2, window_bounds = array<i64: 9, 256>}, {transform_indices = @transform_3, window_bounds = array<i64: 1, 32, 1>}, {pipeline_mode = #tpu.pipeline_mode<synchronous>, transform_indices = @transform_4, window_bounds = array<i64: 1, 256>}, {pipeline_mode = #tpu.pipeline_mode<synchronous>, transform_indices = @transform_5, window_bounds = array<i64: 32, 72>}, {pipeline_mode = #tpu.pipeline_mode<synchronous>, transform_indices = @transform_6, window_bounds = array<i64: 32, 72>}, {pipeline_mode = #tpu.pipeline_mode<synchronous>, transform_indices = @transform_7, window_bounds = array<i64: 32, 1>}, {pipeline_mode = #tpu.pipeline_mode<synchronous>, transform_indices = @transform_8, window_bounds = array<i64: 5, 288>}, {pipeline_mode = #tpu.pipeline_mode<synchronous>, transform_indices = @transform_9, window_bounds = array<i64: 5, 1>}, {transform_indices = @transform_10, window_bounds = array<i64: 5, 256>}]} {
    %c0 = arith.constant 0 : index
    %c0_0 = arith.constant 0 : index
    %0 = vector.load %arg3[%c0, %c0_0] : memref<9x256xf32, #tpu.memory_space<vmem>>, vector<9x256xf32>
    %c0_1 = arith.constant 0 : index
    %c0_2 = arith.constant 0 : index
    %1 = vector.load %arg2[%c0_1, %c0_2] : memref<8x256xf32, #tpu.memory_space<vmem>>, vector<8x256xf32>
    %c17_i32 = arith.constant 17 : i32
    %2 = tpu.dynamic_rotate %1 by %c17_i32 dim 1 : vector<8x256xf32>, i32 -> vector<8x256xf32>
    %3 = vector.extract_strided_slice %0 {offsets = [0, 0], sizes = [1, 256], strides = [1, 1]} : vector<9x256xf32> to vector<1x256xf32>
    %4 = vector.broadcast %3 : vector<1x256xf32> to vector<8x256xf32>
    %5 = arith.mulf %2, %4 : vector<8x256xf32>
    %c16_i32 = arith.constant 16 : i32
    %6 = tpu.dynamic_rotate %1 by %c16_i32 dim 1 : vector<8x256xf32>, i32 -> vector<8x256xf32>
    %7 = vector.extract_strided_slice %0 {offsets = [1, 0], sizes = [1, 256], strides = [1, 1]} : vector<9x256xf32> to vector<1x256xf32>
    %8 = vector.broadcast %7 : vector<1x256xf32> to vector<8x256xf32>
    %9 = arith.mulf %6, %8 : vector<8x256xf32>
    %c15_i32 = arith.constant 15 : i32
    %10 = tpu.dynamic_rotate %1 by %c15_i32 dim 1 : vector<8x256xf32>, i32 -> vector<8x256xf32>
    %11 = vector.extract_strided_slice %0 {offsets = [2, 0], sizes = [1, 256], strides = [1, 1]} : vector<9x256xf32> to vector<1x256xf32>
    %12 = vector.broadcast %11 : vector<1x256xf32> to vector<8x256xf32>
    %13 = arith.mulf %10, %12 : vector<8x256xf32>
    %c1_i32 = arith.constant 1 : i32
    %14 = tpu.dynamic_rotate %1 by %c1_i32 dim 1 : vector<8x256xf32>, i32 -> vector<8x256xf32>
    %15 = vector.extract_strided_slice %0 {offsets = [3, 0], sizes = [1, 256], strides = [1, 1]} : vector<9x256xf32> to vector<1x256xf32>
    %16 = vector.broadcast %15 : vector<1x256xf32> to vector<8x256xf32>
    %17 = arith.mulf %14, %16 : vector<8x256xf32>
    %18 = vector.extract_strided_slice %0 {offsets = [4, 0], sizes = [1, 256], strides = [1, 1]} : vector<9x256xf32> to vector<1x256xf32>
    %19 = vector.broadcast %18 : vector<1x256xf32> to vector<8x256xf32>
    %20 = arith.mulf %1, %19 : vector<8x256xf32>
    %c255_i32 = arith.constant 255 : i32
    %21 = tpu.dynamic_rotate %1 by %c255_i32 dim 1 : vector<8x256xf32>, i32 -> vector<8x256xf32>
    %22 = vector.extract_strided_slice %0 {offsets = [5, 0], sizes = [1, 256], strides = [1, 1]} : vector<9x256xf32> to vector<1x256xf32>
    %23 = vector.broadcast %22 : vector<1x256xf32> to vector<8x256xf32>
    %24 = arith.mulf %21, %23 : vector<8x256xf32>
    %c241_i32 = arith.constant 241 : i32
    %25 = tpu.dynamic_rotate %1 by %c241_i32 dim 1 : vector<8x256xf32>, i32 -> vector<8x256xf32>
    %26 = vector.extract_strided_slice %0 {offsets = [6, 0], sizes = [1, 256], strides = [1, 1]} : vector<9x256xf32> to vector<1x256xf32>
    %27 = vector.broadcast %26 : vector<1x256xf32> to vector<8x256xf32>
    %28 = arith.mulf %25, %27 : vector<8x256xf32>
    %c240_i32 = arith.constant 240 : i32
    %29 = tpu.dynamic_rotate %1 by %c240_i32 dim 1 : vector<8x256xf32>, i32 -> vector<8x256xf32>
    %30 = vector.extract_strided_slice %0 {offsets = [7, 0], sizes = [1, 256], strides = [1, 1]} : vector<9x256xf32> to vector<1x256xf32>
    %31 = vector.broadcast %30 : vector<1x256xf32> to vector<8x256xf32>
    %32 = arith.mulf %29, %31 : vector<8x256xf32>
    %c239_i32 = arith.constant 239 : i32
    %33 = tpu.dynamic_rotate %1 by %c239_i32 dim 1 : vector<8x256xf32>, i32 -> vector<8x256xf32>
    %34 = vector.extract_strided_slice %0 {offsets = [8, 0], sizes = [1, 256], strides = [1, 1]} : vector<9x256xf32> to vector<1x256xf32>
    %35 = vector.broadcast %34 : vector<1x256xf32> to vector<8x256xf32>
    %36 = arith.mulf %33, %35 : vector<8x256xf32>
    %37 = tpu.concatenate %5, %9, %13, %17, %20, %24, %28, %32, %36 in 0 : vector<8x256xf32>, vector<8x256xf32>, vector<8x256xf32>, vector<8x256xf32>, vector<8x256xf32>, vector<8x256xf32>, vector<8x256xf32>, vector<8x256xf32>, vector<8x256xf32> -> vector<72x256xf32>
    %38 = arith.truncf %37 : vector<72x256xf32> to vector<72x256xbf16>
    %c0_3 = arith.constant 0 : index
    %c0_4 = arith.constant 0 : index
    %39 = vector.load %arg7[%c0_3, %c0_4] : memref<32x72xbf16, #tpu.memory_space<vmem>>, vector<32x72xbf16>
    %cst = arith.constant dense<0.000000e+00> : vector<32x256xf32>
    %40 = tpu.matmul %39, %38, %cst {dimension_numbers = #tpu.dot_dimension_numbers<[1], [0], [0], [1], [0, 0, 1, 1], [], []>} : vector<32x72xbf16>, vector<72x256xbf16>, vector<32x256xf32> -> vector<32x256xf32>
    %c0_5 = arith.constant 0 : index
    %c0_6 = arith.constant 0 : index
    %41 = vector.load %arg8[%c0_5, %c0_6] : memref<32x1xf32, #tpu.memory_space<vmem>>, vector<32x1xf32>
    %42 = vector.broadcast %41 : vector<32x1xf32> to vector<32x256xf32>
    %43 = arith.addf %40, %42 : vector<32x256xf32>
    %c0_7 = arith.constant 0 : index
    %c0_8 = arith.constant 0 : index
    %44 = vector.load %arg1[%c0_7, %c0_8] : memref<8x256xf32, #tpu.memory_space<vmem>>, vector<8x256xf32>
    %c17_i32_9 = arith.constant 17 : i32
    %45 = tpu.dynamic_rotate %44 by %c17_i32_9 dim 1 : vector<8x256xf32>, i32 -> vector<8x256xf32>
    %46 = vector.extract_strided_slice %0 {offsets = [0, 0], sizes = [1, 256], strides = [1, 1]} : vector<9x256xf32> to vector<1x256xf32>
    %47 = vector.broadcast %46 : vector<1x256xf32> to vector<8x256xf32>
    %48 = arith.mulf %45, %47 : vector<8x256xf32>
    %c16_i32_10 = arith.constant 16 : i32
    %49 = tpu.dynamic_rotate %44 by %c16_i32_10 dim 1 : vector<8x256xf32>, i32 -> vector<8x256xf32>
    %50 = vector.extract_strided_slice %0 {offsets = [1, 0], sizes = [1, 256], strides = [1, 1]} : vector<9x256xf32> to vector<1x256xf32>
    %51 = vector.broadcast %50 : vector<1x256xf32> to vector<8x256xf32>
    %52 = arith.mulf %49, %51 : vector<8x256xf32>
    %c15_i32_11 = arith.constant 15 : i32
    %53 = tpu.dynamic_rotate %44 by %c15_i32_11 dim 1 : vector<8x256xf32>, i32 -> vector<8x256xf32>
    %54 = vector.extract_strided_slice %0 {offsets = [2, 0], sizes = [1, 256], strides = [1, 1]} : vector<9x256xf32> to vector<1x256xf32>
    %55 = vector.broadcast %54 : vector<1x256xf32> to vector<8x256xf32>
    %56 = arith.mulf %53, %55 : vector<8x256xf32>
    %c1_i32_12 = arith.constant 1 : i32
    %57 = tpu.dynamic_rotate %44 by %c1_i32_12 dim 1 : vector<8x256xf32>, i32 -> vector<8x256xf32>
    %58 = vector.extract_strided_slice %0 {offsets = [3, 0], sizes = [1, 256], strides = [1, 1]} : vector<9x256xf32> to vector<1x256xf32>
    %59 = vector.broadcast %58 : vector<1x256xf32> to vector<8x256xf32>
    %60 = arith.mulf %57, %59 : vector<8x256xf32>
    %61 = vector.extract_strided_slice %0 {offsets = [4, 0], sizes = [1, 256], strides = [1, 1]} : vector<9x256xf32> to vector<1x256xf32>
    %62 = vector.broadcast %61 : vector<1x256xf32> to vector<8x256xf32>
    %63 = arith.mulf %44, %62 : vector<8x256xf32>
    %c255_i32_13 = arith.constant 255 : i32
    %64 = tpu.dynamic_rotate %44 by %c255_i32_13 dim 1 : vector<8x256xf32>, i32 -> vector<8x256xf32>
    %65 = vector.extract_strided_slice %0 {offsets = [5, 0], sizes = [1, 256], strides = [1, 1]} : vector<9x256xf32> to vector<1x256xf32>
    %66 = vector.broadcast %65 : vector<1x256xf32> to vector<8x256xf32>
    %67 = arith.mulf %64, %66 : vector<8x256xf32>
    %c241_i32_14 = arith.constant 241 : i32
    %68 = tpu.dynamic_rotate %44 by %c241_i32_14 dim 1 : vector<8x256xf32>, i32 -> vector<8x256xf32>
    %69 = vector.extract_strided_slice %0 {offsets = [6, 0], sizes = [1, 256], strides = [1, 1]} : vector<9x256xf32> to vector<1x256xf32>
    %70 = vector.broadcast %69 : vector<1x256xf32> to vector<8x256xf32>
    %71 = arith.mulf %68, %70 : vector<8x256xf32>
    %c240_i32_15 = arith.constant 240 : i32
    %72 = tpu.dynamic_rotate %44 by %c240_i32_15 dim 1 : vector<8x256xf32>, i32 -> vector<8x256xf32>
    %73 = vector.extract_strided_slice %0 {offsets = [7, 0], sizes = [1, 256], strides = [1, 1]} : vector<9x256xf32> to vector<1x256xf32>
    %74 = vector.broadcast %73 : vector<1x256xf32> to vector<8x256xf32>
    %75 = arith.mulf %72, %74 : vector<8x256xf32>
    %c239_i32_16 = arith.constant 239 : i32
    %76 = tpu.dynamic_rotate %44 by %c239_i32_16 dim 1 : vector<8x256xf32>, i32 -> vector<8x256xf32>
    %77 = vector.extract_strided_slice %0 {offsets = [8, 0], sizes = [1, 256], strides = [1, 1]} : vector<9x256xf32> to vector<1x256xf32>
    %78 = vector.broadcast %77 : vector<1x256xf32> to vector<8x256xf32>
    %79 = arith.mulf %76, %78 : vector<8x256xf32>
    %80 = tpu.concatenate %48, %52, %56, %60, %63, %67, %71, %75, %79 in 0 : vector<8x256xf32>, vector<8x256xf32>, vector<8x256xf32>, vector<8x256xf32>, vector<8x256xf32>, vector<8x256xf32>, vector<8x256xf32>, vector<8x256xf32>, vector<8x256xf32> -> vector<72x256xf32>
    %81 = arith.truncf %80 : vector<72x256xf32> to vector<72x256xbf16>
    %c0_17 = arith.constant 0 : index
    %c0_18 = arith.constant 0 : index
    %82 = vector.load %arg6[%c0_17, %c0_18] : memref<32x72xbf16, #tpu.memory_space<vmem>>, vector<32x72xbf16>
    %cst_19 = arith.constant dense<0.000000e+00> : vector<32x256xf32>
    %83 = tpu.matmul %82, %81, %cst_19 {dimension_numbers = #tpu.dot_dimension_numbers<[1], [0], [0], [1], [0, 0, 1, 1], [], []>} : vector<32x72xbf16>, vector<72x256xbf16>, vector<32x256xf32> -> vector<32x256xf32>
    %c0_20 = arith.constant 0 : index
    %c0_21 = arith.constant 0 : index
    %c0_22 = arith.constant 0 : index
    %84 = vector.load %arg4[%c0_20, %c0_21, %c0_22] : memref<1x32x1xf32, #tpu.memory_space<vmem>>, vector<1x32x1xf32>
    %85 = vector.shape_cast %84 : vector<1x32x1xf32> to vector<32x1xf32>
    %c0_23 = arith.constant 0 : index
    %c0_24 = arith.constant 0 : index
    %86 = vector.load %arg5[%c0_23, %c0_24] : memref<1x256xf32, #tpu.memory_space<vmem>>, vector<1x256xf32>
    %87 = vector.broadcast %85 : vector<32x1xf32> to vector<32x256xf32>
    %88 = vector.broadcast %86 : vector<1x256xf32> to vector<32x256xf32>
    %89 = arith.mulf %87, %88 : vector<32x256xf32>
    %90 = arith.addf %83, %43 : vector<32x256xf32>
    %91 = arith.addf %90, %89 : vector<32x256xf32>
    %92 = arith.negf %91 : vector<32x256xf32>
    %93 = math.exp %92 : vector<32x256xf32>
    %cst_25 = arith.constant 1.000000e+00 : f32
    %94 = vector.broadcast %cst_25 : f32 to vector<32x256xf32>
    %95 = arith.addf %94, %93 : vector<32x256xf32>
    %96 = arith.divf %94, %95 : vector<32x256xf32>
    %97 = arith.mulf %91, %96 : vector<32x256xf32>
    %c17_i32_26 = arith.constant 17 : i32
    %98 = tpu.dynamic_rotate %97 by %c17_i32_26 dim 1 : vector<32x256xf32>, i32 -> vector<32x256xf32>
    %99 = vector.extract_strided_slice %0 {offsets = [0, 0], sizes = [1, 256], strides = [1, 1]} : vector<9x256xf32> to vector<1x256xf32>
    %100 = vector.broadcast %99 : vector<1x256xf32> to vector<32x256xf32>
    %101 = arith.mulf %98, %100 : vector<32x256xf32>
    %c16_i32_27 = arith.constant 16 : i32
    %102 = tpu.dynamic_rotate %97 by %c16_i32_27 dim 1 : vector<32x256xf32>, i32 -> vector<32x256xf32>
    %103 = vector.extract_strided_slice %0 {offsets = [1, 0], sizes = [1, 256], strides = [1, 1]} : vector<9x256xf32> to vector<1x256xf32>
    %104 = vector.broadcast %103 : vector<1x256xf32> to vector<32x256xf32>
    %105 = arith.mulf %102, %104 : vector<32x256xf32>
    %c15_i32_28 = arith.constant 15 : i32
    %106 = tpu.dynamic_rotate %97 by %c15_i32_28 dim 1 : vector<32x256xf32>, i32 -> vector<32x256xf32>
    %107 = vector.extract_strided_slice %0 {offsets = [2, 0], sizes = [1, 256], strides = [1, 1]} : vector<9x256xf32> to vector<1x256xf32>
    %108 = vector.broadcast %107 : vector<1x256xf32> to vector<32x256xf32>
    %109 = arith.mulf %106, %108 : vector<32x256xf32>
    %c1_i32_29 = arith.constant 1 : i32
    %110 = tpu.dynamic_rotate %97 by %c1_i32_29 dim 1 : vector<32x256xf32>, i32 -> vector<32x256xf32>
    %111 = vector.extract_strided_slice %0 {offsets = [3, 0], sizes = [1, 256], strides = [1, 1]} : vector<9x256xf32> to vector<1x256xf32>
    %112 = vector.broadcast %111 : vector<1x256xf32> to vector<32x256xf32>
    %113 = arith.mulf %110, %112 : vector<32x256xf32>
    %114 = vector.extract_strided_slice %0 {offsets = [4, 0], sizes = [1, 256], strides = [1, 1]} : vector<9x256xf32> to vector<1x256xf32>
    %115 = vector.broadcast %114 : vector<1x256xf32> to vector<32x256xf32>
    %116 = arith.mulf %97, %115 : vector<32x256xf32>
    %c255_i32_30 = arith.constant 255 : i32
    %117 = tpu.dynamic_rotate %97 by %c255_i32_30 dim 1 : vector<32x256xf32>, i32 -> vector<32x256xf32>
    %118 = vector.extract_strided_slice %0 {offsets = [5, 0], sizes = [1, 256], strides = [1, 1]} : vector<9x256xf32> to vector<1x256xf32>
    %119 = vector.broadcast %118 : vector<1x256xf32> to vector<32x256xf32>
    %120 = arith.mulf %117, %119 : vector<32x256xf32>
    %c241_i32_31 = arith.constant 241 : i32
    %121 = tpu.dynamic_rotate %97 by %c241_i32_31 dim 1 : vector<32x256xf32>, i32 -> vector<32x256xf32>
    %122 = vector.extract_strided_slice %0 {offsets = [6, 0], sizes = [1, 256], strides = [1, 1]} : vector<9x256xf32> to vector<1x256xf32>
    %123 = vector.broadcast %122 : vector<1x256xf32> to vector<32x256xf32>
    %124 = arith.mulf %121, %123 : vector<32x256xf32>
    %c240_i32_32 = arith.constant 240 : i32
    %125 = tpu.dynamic_rotate %97 by %c240_i32_32 dim 1 : vector<32x256xf32>, i32 -> vector<32x256xf32>
    %126 = vector.extract_strided_slice %0 {offsets = [7, 0], sizes = [1, 256], strides = [1, 1]} : vector<9x256xf32> to vector<1x256xf32>
    %127 = vector.broadcast %126 : vector<1x256xf32> to vector<32x256xf32>
    %128 = arith.mulf %125, %127 : vector<32x256xf32>
    %c239_i32_33 = arith.constant 239 : i32
    %129 = tpu.dynamic_rotate %97 by %c239_i32_33 dim 1 : vector<32x256xf32>, i32 -> vector<32x256xf32>
    %130 = vector.extract_strided_slice %0 {offsets = [8, 0], sizes = [1, 256], strides = [1, 1]} : vector<9x256xf32> to vector<1x256xf32>
    %131 = vector.broadcast %130 : vector<1x256xf32> to vector<32x256xf32>
    %132 = arith.mulf %129, %131 : vector<32x256xf32>
    %133 = tpu.concatenate %101, %105, %109, %113, %116, %120, %124, %128, %132 in 0 : vector<32x256xf32>, vector<32x256xf32>, vector<32x256xf32>, vector<32x256xf32>, vector<32x256xf32>, vector<32x256xf32>, vector<32x256xf32>, vector<32x256xf32>, vector<32x256xf32> -> vector<288x256xf32>
    %134 = arith.truncf %133 : vector<288x256xf32> to vector<288x256xbf16>
    %c0_34 = arith.constant 0 : index
    %c0_35 = arith.constant 0 : index
    %135 = vector.load %arg9[%c0_34, %c0_35] : memref<5x288xbf16, #tpu.memory_space<vmem>>, vector<5x288xbf16>
    %cst_36 = arith.constant dense<0.000000e+00> : vector<5x256xf32>
    %136 = tpu.matmul %135, %134, %cst_36 {dimension_numbers = #tpu.dot_dimension_numbers<[1], [0], [0], [1], [0, 0, 1, 1], [], []>} : vector<5x288xbf16>, vector<288x256xbf16>, vector<5x256xf32> -> vector<5x256xf32>
    %c0_37 = arith.constant 0 : index
    %c0_38 = arith.constant 0 : index
    %137 = vector.load %arg10[%c0_37, %c0_38] : memref<5x1xf32, #tpu.memory_space<vmem>>, vector<5x1xf32>
    %138 = vector.broadcast %137 : vector<5x1xf32> to vector<5x256xf32>
    %139 = arith.addf %136, %138 : vector<5x256xf32>
    %c0_39 = arith.constant 0 : index
    %c0_40 = arith.constant 0 : index
    %140 = vector.load %arg11[%c0_39, %c0_40] : memref<5x256xf32, #tpu.memory_space<vmem>>, vector<5x256xf32>
    tpu.vector_store %arg11[%c0_39, %c0_40], %139 {strides = array<i32>} : memref<5x256xf32, #tpu.memory_space<vmem>>, vector<5x256xf32>,
    return
  }
  func.func @transform_0(%arg0: i32) -> (i32, i32) {
    %c0_i32 = arith.constant 0 : i32
    %c0_i32_0 = arith.constant 0 : i32
    return %c0_i32, %arg0 : i32, i32
  }
  func.func @transform_1(%arg0: i32) -> (i32, i32) {
    %c0_i32 = arith.constant 0 : i32
    %c0_i32_0 = arith.constant 0 : i32
    %c0_i32_1 = arith.constant 0 : i32
    return %c0_i32, %c0_i32_0 : i32, i32
  }
  func.func @transform_2(%arg0: i32) -> (i32, i32) {
    %c0_i32 = arith.constant 0 : i32
    %c0_i32_0 = arith.constant 0 : i32
    %c0_i32_1 = arith.constant 0 : i32
    return %c0_i32, %c0_i32_0 : i32, i32
  }
  func.func @transform_3(%arg0: i32) -> (i32, i32, i32) {
    %c0_i32 = arith.constant 0 : i32
    %c0_i32_0 = arith.constant 0 : i32
    %c0_i32_1 = arith.constant 0 : i32
    return %arg0, %c0_i32, %c0_i32_0 : i32, i32, i32
  }
  func.func @transform_4(%arg0: i32) -> (i32, i32) {
    %c0_i32 = arith.constant 0 : i32
    %c0_i32_0 = arith.constant 0 : i32
    %c0_i32_1 = arith.constant 0 : i32
    return %c0_i32, %c0_i32_0 : i32, i32
  }
  func.func @transform_5(%arg0: i32) -> (i32, i32) {
    %c0_i32 = arith.constant 0 : i32
    %c0_i32_0 = arith.constant 0 : i32
    %c0_i32_1 = arith.constant 0 : i32
    return %c0_i32, %c0_i32_0 : i32, i32
  }
  func.func @transform_6(%arg0: i32) -> (i32, i32) {
    %c0_i32 = arith.constant 0 : i32
    %c0_i32_0 = arith.constant 0 : i32
    %c0_i32_1 = arith.constant 0 : i32
    return %c0_i32, %c0_i32_0 : i32, i32
  }
  func.func @transform_7(%arg0: i32) -> (i32, i32) {
    %c0_i32 = arith.constant 0 : i32
    %c0_i32_0 = arith.constant 0 : i32
    %c0_i32_1 = arith.constant 0 : i32
    return %c0_i32, %c0_i32_0 : i32, i32
  }
  func.func @transform_8(%arg0: i32) -> (i32, i32) {
    %c0_i32 = arith.constant 0 : i32
    %c0_i32_0 = arith.constant 0 : i32
    %c0_i32_1 = arith.constant 0 : i32
    return %c0_i32, %c0_i32_0 : i32, i32
  }
  func.func @transform_9(%arg0: i32) -> (i32, i32) {
    %c0_i32 = arith.constant 0 : i32
    %c0_i32_0 = arith.constant 0 : i32
    %c0_i32_1 = arith.constant 0 : i32
    return %c0_i32, %c0_i32_0 : i32, i32
  }
  func.func @transform_10(%arg0: i32) -> (i32, i32) {
    %c0_i32 = arith.constant 0 : i32
    %c0_i32_0 = arith.constant 0 : i32
    return %c0_i32, %arg0 : i32, i32
  }
}

</mosaic_0001>

<bundles_post_ra>
// kernel: tpu_custom_call.1
= control target key start
LH: loop header
LB: loop body
LE: loop exit
PB: predicated region body
PF: predicated region fallthrough
CT: control target
= control target key end

     0   :  { %15 = vsyncpa [#allocation3], 0  ;;  %s2796_s0 = inlined_call_operand.vmem [shape: f32[8,512], index: 0, kind: input, shape index: {}]   ;;  %s2797_s1 = inlined_call_operand.vmem [shape: f32[8,256], index: 1, kind: input, shape index: {}]   ;;  %s2798_s2 = inlined_call_operand.vmem [shape: f32[9,256], index: 2, kind: input, shape index: {}]   ;;  %s2799_s3 = inlined_call_operand.vmem [shape: f32[2,32,1], index: 3, kind: input, shape index: {}]   ;;  %s2800_s4 = inlined_call_operand.vmem [shape: f32[1,256], index: 4, kind: input, shape index: {}]   ;;  %s2801_s5 = inlined_call_operand.vmem [shape: bf16[32,72], index: 5, kind: input, shape index: {}]   ;;  %s2802_s6 = inlined_call_operand.hbm [shape: bf16[32,72], index: 6, kind: input, shape index: {}]   ;;  %s2803_s7 = inlined_call_operand.vmem [shape: f32[32,1], index: 7, kind: input, shape index: {}]   ;;  %s2804_s8 = inlined_call_operand.hbm [shape: bf16[5,288], index: 8, kind: input, shape index: {}]   ;;  %s2805_s9 = inlined_call_operand.vmem [shape: f32[5,1], index: 9, kind: input, shape index: {}]   ;;  %s2806_s10 = inlined_call_operand.hbm [shape: f32[5,512], index: 10, kind: output, shape index: {}]  }
   0x1   :  { %16 = vsyncpa [#allocation6], 0 }
   0x2   :  { %17 = vsyncpa [#allocation4], 0 }
   0x3   :  { %19 = vsyncpa [#allocation4 + $0x1], 0  ;;  %s1842_s13 = smov 0   ;;  %s1844_s14 = smov 0  }
   0x4   :  { %s1846_s15 = smov 0   ;;  %s1848_s16 = smov 0  }
   0x5 LB: > { %s1863_s17 = sadd.s32 4294967295, %s1772_s16   ;;  %s1474_s18 = sadd.s32 4294967294, %s1772_s16   ;;  %s1772_s16 = sphi %s1848_s16, %s2880_s16   ;;  %s1768_s15 = sphi %s1846_s15, %s2879_s15   ;;  %s1764_s14 = sphi %s1844_s14, %s2878_s14   ;;  %s1760_s13 = sphi %s1842_s13, %s2877_s13  }
   0x6   : > { %s1867_s19 = sadd.s32 1, %s1772_s16   ;;  %s252_s20 = sadd.s32 1, %s1768_s15 }
   0x7   : > { %s249_s21 = ssub.s32 %s1772_s16, %s1867_s19  ;;  %p262_p0 = scmp.ne.s32.totalorder %s1768_s15, %s1764_s14 }
   0x8   : > { %p250_p1 = scmp.eq.s32.totalorder %s249_s21, 0  ;;  %p263_p2 = scmp.eq.s32.totalorder %s1863_s17, 1 }
   0x9   : > { %p268_p3 = scmp.ne.s32.totalorder %s1764_s14, %s1760_s13  ;;  %p269_p4 = scmp.eq.s32.totalorder %s1474_s18, 1 }
   0xa   : > { %s1878_s22 = scalar_select %p250_p1, %s1768_s15, %s252_s20  }
   0xb   : > { %p1880_p5 = por %p263_p2, %p262_p0  ;;  %p1884_p6 = por %p269_p4, %p268_p3 }
   0xc   : > { %2826 = sst [smem:[#allocation11_spill]] %s1878_s22  ;;  %p1475_p7 = scmp.ge.s32.totalorder %s1772_s16, 1 }
   0xd   : > { %p276_p8 = scmp.lt.s32.totalorder %s1772_s16, 3  ;;  %p1553_p9 = scmp.eq.s32.totalorder %s1863_s17, 0 }
   0xe   : > { %s299_s28 = sshll.u32 %s2802_s6, 4  ;;  %s1774_s29 = smov [#allocation2]   ;;  %s300_s28 = int_to_ptr.hbm [resolvable:$true] %s299_s28 }
   0xf   : > { %p1891_p10 = pnand %p1475_p7, %p276_p8  ;;  %s301_s30 = sshll.u32 %s1774_s29, 4  ;;  %s302_s30 = int_to_ptr.vmem [resolvable:$true] %s301_s30 }
  0x10   : > { %s317_s18 = sshll.u32 %s2804_s8, 4  ;;  %s1775_s20 = smov 64   ;;  %s318_s18 = int_to_ptr.hbm [resolvable:$true] %s317_s18 }
  0x11   : > { %p1542_p11 = pneg %p1891_p10  ;;  %s1776_s21 = smov 4  }
  0x12   : > { %s1777_s22 = smov [#allocation5]   ;;  %352 = sbr.rel (%p1891_p10) target bundleno = 821 (0x335), region = 60 }
  0x13   : > { %p1543_p12 = pnand %p1553_p9, %p1542_p11  ;;  %s319_s26 = sshll.u32 %s1777_s22, 4  ;;  %s320_s26 = int_to_ptr.vmem [resolvable:$true] %s319_s26 }
  0x15   : > { %1545 = dma.hbm_to_vmem [thread:$0]  (!%p1543_p12), %s300_s28, 256, %s302_s30, [#allocation3], %s1775_s20, %s1775_s20, %s1776_s21  }
  0x16   : > { %1548 = dma.hbm_to_vmem [thread:$0]  (!%p1543_p12), %s318_s18, 192, %s320_s26, [#allocation6]  }
  0x17   : > { %1747 = dma.done.wait (%p1553_p9), [#allocation3], 256  }
  0x18   : > { %1749 = vsyncadd (%p1553_p9), [#allocation3], 4294967040 }
  0x19   : > { %1751 = dma.done.wait (%p1553_p9), [#allocation6], 192  }
  0x1a   : > { %1753 = vsyncadd (%p1553_p9), [#allocation6], 4294967104  ;;  %s1483_s27 = sshll.u32 %s1863_s17, 1  ;;  %v1924_v1 = vld [vmem:[%s2797_s1] sm:$0xff]  ;;  %s2807_s12 = smov 111   ;;  %v1937_v3 = vld [vmem:[%s2797_s1 + $0x8] sm:$0xff]  ;;  %v424_v6 = vlaneseq }
  0x1b   : > { %p402_p13 = scmp.lt.s32.totalorder %s1483_s27, 3  ;;  %503 = vrot.lane.b32.xlu1 %v1924_v1, %s2807_s12  ;;  %s1779_s18 = smov 113   ;;  %v1606_v11 = vld [vmem:[%s2798_s2 + $0x10] ss:$0 sm:$0xff]  ;;  %v1607_v12 = vld [vmem:[%s2798_s2 + $0x18] ss:$0 sm:$0xff] }
  0x1c   : > { %s1780_s26 = smov 112   ;;  %s1783_s28 = smov 1   ;;  %v1997_v9 = vand.u32 127, %v424_v6  ;;  %v2009_v13 = vld [vmem:[%s2798_s2] sm:$0xff]  ;;  %v2022_v20 = vld [vmem:[%s2798_s2 + $0x8] sm:$0xff]  ;;  %vm569_vm2 = vcmask 1043456  }
  0x1d   : > { %s2882_s27 = smov (!%p402_p13, %s1483_s27), 3  ;;  %s2809_s25 = smov 17   ;;  %v2026_v25 = vperm.slane %v2009_v13, 6  ;;  %v2029_v30 = vperm.slane %v2022_v20, 6  ;;  %v2033_v31 = vperm.slane %v2009_v13, 7  ;;  %v2036_v32 = vperm.slane %v2022_v20, 7 }
  0x1e   : > { %s1484_s22 = sshll.u32 %s2882_s27, 3  ;;  %s1781_s27 = smov 127   ;;  %vm507_vm0 = vcmp.lt.s32.totalorder %v1997_v9, 111  ;;  %vm485_vm1 = vcmp.lt.s32.totalorder %v1997_v9, 113  ;;  %vm496_vm3 = vcmp.lt.s32.totalorder %v1997_v9, 112  ;;  %v2063_v63 = vperm.slane %v2009_v13, 4 }
  0x1f   : > { %s405_s29 = scalar_lea.vmem %s2796_s0, %s1484_s22  ;;  %s1782_s22 = smov 15   ;;  %vm474_vm4 = vcmp.lt.s32.totalorder %v1997_v9, 127  ;;  %v2074_v6 = vperm.slane %v2022_v20, 5  ;;  %vm448_vm5 = vcmp.lt.s32.totalorder %v1997_v9, 15  ;;  %vm459_vm6 = vcmp.lt.s32.totalorder %v1997_v9, 1 }
  0x20   : > { %v1919_v0 = vld [vmem:[%s405_s29] sm:$0xff]  ;;  %v1932_v2 = vld [vmem:[%s405_s29 + $0x8] sm:$0xff]  ;;  %s1785_s29 = smov 16   ;;  %p407_p0 = scmp.lt.s32.totalorder %s1863_s17, 1  ;;  %vm426_vm7 = vcmp.lt.s32.totalorder %v1997_v9, 17  ;;  %vm437_vm8 = vcmp.lt.s32.totalorder %v1997_v9, 16 }
  0x21   : > { %674 = vrot.lane.b32.xlu0 %v1919_v0, %s2807_s12  ;;  %658 = vrot.lane.b32.xlu2 %v1919_v0, %s1779_s18  ;;  %vm562_vm9 = vcmask 588800   ;;  %s398_s21 = sand.u32 1, %s1764_s14   ;;  %s1531_s11 = sshll.u32 %s1863_s17, 4 }
  0x23   : > { %505 = vrot.lane.b32.xlu1 %v1937_v3, %s2807_s12 }
  0x29   : > { %676 = vrot.lane.b32.xlu0 %v1932_v2, %s2807_s12  ;;  %660 = vrot.lane.b32.xlu2 %v1932_v2, %s1779_s18  ;;  %s408_s12 = scalar_select %p407_p0, %s1863_s17, 1 }
  0x2a   : > { %s1365_s17 = scalar_lea.sflag [#allocation4], %s398_s21 }
  0x2b   : > { %668 = vrot.lane.b32.xlu1 %v1932_v2, %s1780_s26 }
  0x31   : > { %666 = vrot.lane.b32.xlu0 %v1919_v0, %s1780_s26  ;;  %481 = vrot.lane.b32.xlu2 %v1924_v1, %s1779_s18 }
  0x33   : > { %492 = vrot.lane.b32.xlu1 %v1924_v1, %s1780_s26 }
  0x39   : > { %483 = vrot.lane.b32.xlu0 %v1937_v3, %s1779_s18  ;;  %494 = vrot.lane.b32.xlu2 %v1937_v3, %s1780_s26 }
  0x3b   : > { %652 = vrot.lane.b32.xlu1 %v1932_v2, %s1781_s27 }
  0x41   : > { %650 = vrot.lane.b32.xlu0 %v1919_v0, %s1781_s27  ;;  %470 = vrot.lane.b32.xlu2 %v1924_v1, %s1781_s27 }
  0x43   : > { %632 = vrot.lane.b32.xlu1 %v1919_v0, %s1782_s22 }
  0x49   : > { %472 = vrot.lane.b32.xlu0 %v1937_v3, %s1781_s27  ;;  %634 = vrot.lane.b32.xlu2 %v1932_v2, %s1782_s22 }
  0x4b   : > { %642 = vrot.lane.b32.xlu1 %v1932_v2, %s1783_s28 }
  0x51   : > { %640 = vrot.lane.b32.xlu0 %v1919_v0, %s1783_s28  ;;  %444 = vrot.lane.b32.xlu2 %v1924_v1, %s1782_s22 }
  0x53   : > { %455 = vrot.lane.b32.xlu1 %v1924_v1, %s1783_s28 }
  0x59   : > { %446 = vrot.lane.b32.xlu0 %v1937_v3, %s1782_s22  ;;  %457 = vrot.lane.b32.xlu2 %v1937_v3, %s1783_s28 }
  0x5b   : > { %618 = vrot.lane.b32.xlu1 %v1932_v2, %s2809_s25 }
  0x61   : > { %616 = vrot.lane.b32.xlu0 %v1919_v0, %s2809_s25  ;;  %624 = vrot.lane.b32.xlu2 %v1919_v0, %s1785_s29 }
  0x63   : > { %420 = vrot.lane.b32.xlu1 %v1924_v1, %s2809_s25 }
  0x69   : > { %626 = vrot.lane.b32.xlu0 %v1932_v2, %s1785_s29  ;;  %422 = vrot.lane.b32.xlu2 %v1937_v3, %s2809_s25  ;;  %s1526_s25 = sshll.u32 %s408_s12, 5  ;;  %s1482_s12 = sshll.u32 %s398_s21, 4 }
  0x6a   : > { %s2090_s30 = scalar_lea.vmem %s2799_s3, %s1526_s25 }
  0x6b   : > { %435 = vrot.lane.b32.xlu1 %v1937_v3, %s1785_s29 }
  0x71   : > { %433 = vrot.lane.b32.xlu0 %v1924_v1, %s1785_s29 }
  0x7b   : > { %v659_v4 = vpop.permute.xlu2 %658 }
  0x83   : > { %v661_v5 = vpop.permute.xlu2 %660 }
  0x84   : > { %v662_v38 = vsel %vm485_vm1, %v659_v4, %v661_v5  ;;  %v663_v39 = vsel %vm485_vm1, %v661_v5, %v659_v4  ;;  %v2066_v4 = vperm.slane %v2022_v20, 4  ;;  %v2071_v5 = vperm.slane %v2009_v13, 5 }
  0x85   : > { %v664_v44 = vmul.f32 %v662_v38, %v2026_v25  ;;  %v665_v45 = vmul.f32 %v663_v39, %v2029_v30 }
  0x86   : > { %2830 = vst [vmem:[#allocation12_spill] sm:$0xff] %v2066_v4 }
  0x8b   : > { %v482_v10 = vpop.permute.xlu2 %481 }
  0x8d   : > { %v504_v8 = vpop.permute.xlu1 %503 }
  0x93   : > { %v675_v7 = vpop.permute.xlu0 %674  ;;  %v495_v33 = vpop.permute.xlu2 %494 }
  0x95   : > { %v506_v15 = vpop.permute.xlu1 %505 }
  0x96   : > { %v508_v18 = vsel %vm507_vm0, %v504_v8, %v506_v15  ;;  %v509_v19 = vsel %vm507_vm0, %v506_v15, %v504_v8 }
  0x97   : > { %v512_v21 = vmul.f32 %v1606_v11, %v508_v18  ;;  %v513_v22 = vmul.f32 %v1607_v12, %v509_v19 }
  0x99   : > { %v522_v26 = vpack.c.bf16 %v512_v21, %v512_v21  ;;  %v523_v27 = vpack.c.bf16 %v513_v22, %v513_v22  ;;  %v468_v21 = vmul.f32 %v2063_v63, %v1924_v1  ;;  %v469_v22 = vmul.f32 %v2066_v4, %v1937_v3 }
  0x9a   : > { %v1786_v1 = vmov 0   ;;  %v2105_v3 = vperm.slane %v2009_v13, 2 }
  0x9b   : > { %v677_v14 = vpop.permute.xlu0 %676  ;;  %v571_v34 = vsel %vm569_vm2, %v522_v26, 0  ;;  %v574_v35 = vsel %vm569_vm2, %v523_v27, 0  ;;  %v471_v50 = vpop.permute.xlu2 %470  ;;  %1605 = vset.pattern.permute.xlu1 %v1786_v1  ;;  %1604 = vset.pattern.permute.xlu0 %v1786_v1 }
  0x9c   : > { %v678_v16 = vsel %vm507_vm0, %v675_v7, %v677_v14  ;;  %v679_v17 = vsel %vm507_vm0, %v677_v14, %v675_v7  ;;  %579 = vmatpush.bf16.msra.mxu0 %v571_v34  ;;  %598 = vmatpush.bf16.msra.mxu1 %v574_v35  ;;  %v2108_v35 = vperm.slane %v2022_v20, 2 }
  0x9d   : > { %v680_v23 = vmul.f32 %v1606_v11, %v678_v16  ;;  %v681_v24 = vmul.f32 %v1607_v12, %v679_v17  ;;  %v669_v41 = vpop.permute.xlu1 %668  ;;  %v649_v11 = vmul.f32 %v1932_v2, %v2066_v4  ;;  %1603 = vset.pattern.permute.xlu2 %v1786_v1  ;;  %v1529_v1 = vld [vmem:[%s2801_s5] sm:$0xff] }
  0x9f   : > { %v690_v28 = vpack.c.bf16 %v680_v23, %v680_v23  ;;  %v691_v29 = vpack.c.bf16 %v681_v24, %v681_v24 }
  0xa1   : > { %v751_v36 = vsel %vm569_vm2, %v690_v28, 0  ;;  %v754_v37 = vsel %vm569_vm2, %v691_v29, 0  ;;  %v698_v28 = vld [vmem:[%s2090_s30 + $0x10] sm:$0xff] }
  0xa2   : > { %759 = vmatpush.bf16.msra.mxu2 %v751_v36  ;;  %778 = vmatpush.bf16.msra.mxu3 %v754_v37  ;;  %v2112_v36 = vperm.slane %v2009_v13, 3  ;;  %v2115_v37 = vperm.slane %v2022_v20, 3 }
  0xa3   : > { %v667_v40 = vpop.permute.xlu0 %666  ;;  %v635_v17 = vpop.permute.xlu2 %634  ;;  %713 = vperm.xlu1 %1605, %v698_v28  }
  0xa4   : > { %v670_v42 = vsel %vm496_vm3, %v667_v40, %v669_v41  ;;  %v671_v43 = vsel %vm496_vm3, %v669_v41, %v667_v40 }
  0xa5   : > { %v672_v46 = vmul.f32 %v670_v42, %v2033_v31  ;;  %v673_v47 = vmul.f32 %v671_v43, %v2036_v32  ;;  %v493_v52 = vpop.permute.xlu1 %492 }
  0xa6   : > { %v497_v55 = vsel %vm496_vm3, %v493_v52, %v495_v33  ;;  %v498_v56 = vsel %vm496_vm3, %v495_v33, %v493_v52 }
  0xa7   : > { %v688_v48 = vpack.c.bf16 %v672_v46, %v664_v44  ;;  %v689_v49 = vpack.c.bf16 %v673_v47, %v665_v45  ;;  %v501_v59 = vmul.f32 %v2033_v31, %v497_v55  ;;  %v502_v60 = vmul.f32 %v2036_v32, %v498_v56 }
  0xa9   : > { %760 = vmatpush.bf16.msra.mxu2 %v688_v48  ;;  %779 = vmatpush.bf16.msra.mxu3 %v689_v49  ;;  %v528_v48 = vld [vmem:[%s2803_s7] sm:$0xff]  ;;  %v531_v49 = vld [vmem:[%s2803_s7 + $0x18] sm:$0xff] }
  0xaa   : > { %549 = vperm.xlu0 %1604, %v531_v49  }
  0xab   : > { %v484_v51 = vpop.permute.xlu0 %483  ;;  %v445_v34 = vpop.permute.xlu2 %444  ;;  %534 = vperm.xlu1 %1605, %v528_v48  }
  0xac   : > { %v486_v53 = vsel %vm485_vm1, %v482_v10, %v484_v51  ;;  %v487_v54 = vsel %vm485_vm1, %v484_v51, %v482_v10  ;;  %v648_v10 = vmul.f32 %v1919_v0, %v2063_v63 }
  0xad   : > { %v490_v57 = vmul.f32 %v2026_v25, %v486_v53  ;;  %v491_v58 = vmul.f32 %v2029_v30, %v487_v54  ;;  %v653_v8 = vpop.permute.xlu1 %652 }
  0xaf   : > { %v520_v61 = vpack.c.bf16 %v501_v59, %v490_v57  ;;  %v521_v62 = vpack.c.bf16 %v502_v60, %v491_v58  ;;  %v696_v59 = vld [vmem:[%s2090_s30] sm:$0xff] }
  0xb1   : > { %580 = vmatpush.bf16.msra.mxu0 %v520_v61  ;;  %599 = vmatpush.bf16.msra.mxu1 %v521_v62 }
  0xb2   : > { %703 = vperm.xlu0 %1604, %v696_v59  }
  0xb3   : > { %v651_v7 = vpop.permute.xlu0 %650  ;;  %v458_v52 = vpop.permute.xlu2 %457 }
  0xb4   : > { %v654_v12 = vsel %vm474_vm4, %v651_v7, %v653_v8  ;;  %v655_v14 = vsel %vm474_vm4, %v653_v8, %v651_v7  ;;  %v697_v8 = vld [vmem:[%s2090_s30 + $0x8] sm:$0xff] }
  0xb5   : > { %v656_v15 = vmul.f32 %v654_v12, %v2071_v5  ;;  %v657_v16 = vmul.f32 %v655_v14, %v2074_v6  ;;  %v633_v2 = vpop.permute.xlu1 %632  ;;  %708 = vperm.xlu1 %1605, %v697_v8  }
  0xb6   : > { %v636_v38 = vsel %vm448_vm5, %v633_v2, %v635_v17  ;;  %v637_v39 = vsel %vm448_vm5, %v635_v17, %v633_v2  ;;  %v2154_v17 = vperm.slane %v2022_v20, 0 }
  0xb7   : > { %v686_v18 = vpack.c.bf16 %v656_v15, %v648_v10  ;;  %v687_v19 = vpack.c.bf16 %v657_v16, %v649_v11  ;;  %v638_v44 = vmul.f32 %v637_v39, %v2105_v3  ;;  %v639_v45 = vmul.f32 %v636_v38, %v2108_v35 }
  0xb8   : > { %v2151_v16 = vperm.slane %v2009_v13, 0 }
  0xb9   : > { %761 = vmatpush.bf16.msra.mxu2 %v686_v18  ;;  %780 = vmatpush.bf16.msra.mxu3 %v687_v19  ;;  %v2158_v18 = vperm.slane %v2009_v13, 1  ;;  %v2161_v19 = vperm.slane %v2022_v20, 1  ;;  %v530_v13 = vld [vmem:[%s2803_s7 + $0x10] sm:$0xff] }
  0xba   : > { %544 = vperm.xlu2 %1603, %v530_v13  }
  0xbb   : > { %v473_v0 = vpop.permute.xlu0 %472  ;;  %v625_v15 = vpop.permute.xlu2 %624 }
  0xbc   : > { %v475_v23 = vsel %vm474_vm4, %v471_v50, %v473_v0  ;;  %v476_v24 = vsel %vm474_vm4, %v473_v0, %v471_v50 }
  0xbd   : > { %v479_v26 = vmul.f32 %v2071_v5, %v475_v23  ;;  %v480_v27 = vmul.f32 %v2074_v6, %v476_v24  ;;  %v643_v41 = vpop.permute.xlu1 %642 }
  0xbf   : > { %v518_v29 = vpack.c.bf16 %v479_v26, %v468_v21  ;;  %v519_v33 = vpack.c.bf16 %v480_v27, %v469_v22 }
  0xc1   : > { %581 = vmatpush.bf16.msra.mxu0 %v518_v29  ;;  %600 = vmatpush.bf16.msra.mxu1 %v519_v33 }
  0xc3   : > { %v641_v40 = vpop.permute.xlu0 %640  ;;  %v423_v29 = vpop.permute.xlu2 %422 }
  0xc4   : > { %v644_v42 = vsel %vm459_vm6, %v641_v40, %v643_v41  ;;  %v645_v43 = vsel %vm459_vm6, %v643_v41, %v641_v40  ;;  %v699_v40 = vld [vmem:[%s2090_s30 + $0x18] sm:$0xff]  ;;  %s2834_s30 = smov 17  }
  0xc5   : > { %v646_v46 = vmul.f32 %v645_v43, %v2112_v36  ;;  %v647_v47 = vmul.f32 %v644_v42, %v2115_v37  ;;  %v456_v54 = vpop.permute.xlu1 %455  ;;  %718 = vperm.xlu2 %1603, %v699_v40  }
  0xc6   : > { %v460_v57 = vsel %vm459_vm6, %v456_v54, %v458_v52  ;;  %v461_v58 = vsel %vm459_vm6, %v458_v52, %v456_v54  ;;  %v529_v52 = vld [vmem:[%s2803_s7 + $0x8] sm:$0xff] }
  0xc7   : > { %v684_v50 = vpack.c.bf16 %v646_v46, %v638_v44  ;;  %v685_v51 = vpack.c.bf16 %v647_v47, %v639_v45  ;;  %v464_v62 = vmul.f32 %v2112_v36, %v461_v58  ;;  %v465_v7 = vmul.f32 %v2115_v37, %v460_v57  ;;  %v1528_v54 = vld [vmem:[#allocation2 + $0x8] sm:$0xff] }
  0xc9   : > { %762 = vmatpush.bf16.msra.mxu2 %v684_v50  ;;  %781 = vmatpush.bf16.msra.mxu3 %v685_v51  ;;  %v1527_v51 = vld [vmem:[#allocation2] sm:$0xff] }
  0xcb   : > { %v447_v53 = vpop.permute.xlu0 %446 }
  0xcc   : > { %v449_v55 = vsel %vm448_vm5, %v445_v34, %v447_v53  ;;  %v450_v56 = vsel %vm448_vm5, %v447_v53, %v445_v34  ;;  %v1530_v53 = vld [vmem:[%s2801_s5 + $0x8] sm:$0xff] }
  0xcd   : > { %v453_v60 = vmul.f32 %v2105_v3, %v450_v56  ;;  %v454_v61 = vmul.f32 %v2108_v35, %v449_v55  ;;  %v619_v14 = vpop.permute.xlu1 %618  ;;  %539 = vperm.xlu2 %1603, %v529_v52   ;;  %v700_v55 = vld [vmem:[%s2800_s4] sm:$0x3] }
  0xce   : > { %v722_v56 = vperm.slane %v700_v55, 0  ;;  %v723_v57 = vperm.slane %v700_v55, 1 }
  0xcf   : > { %v516_v10 = vpack.c.bf16 %v464_v62, %v453_v60  ;;  %v517_v11 = vpack.c.bf16 %v465_v7, %v454_v61 }
  0xd1   : > { %582 = vmatpush.bf16.msra.mxu0 %v516_v10  ;;  %601 = vmatpush.bf16.msra.mxu1 %v517_v11 }
  0xd3   : > { %v617_v12 = vpop.permute.xlu0 %616 }
  0xd4   : > { %v620_v0 = vsel %vm426_vm7, %v617_v12, %v619_v14  ;;  %v621_v2 = vsel %vm426_vm7, %v619_v14, %v617_v12 }
  0xd5   : > { %v421_v22 = vpop.permute.xlu1 %420  ;;  %v622_v20 = vmul.f32 %v621_v2, %v2151_v16  ;;  %v623_v26 = vmul.f32 %v620_v0, %v2154_v17 }
  0xd6   : > { %v427_v38 = vsel %vm426_vm7, %v421_v22, %v423_v29  ;;  %v428_v39 = vsel %vm426_vm7, %v423_v29, %v421_v22 }
  0xd7   : > { %v431_v45 = vmul.f32 %v2151_v16, %v428_v39  ;;  %v432_v46 = vmul.f32 %v2154_v17, %v427_v38 }
  0xdb   : > { %v627_v21 = vpop.permute.xlu0 %626 }
  0xdc   : > { %v628_v23 = vsel %vm437_vm8, %v625_v15, %v627_v21  ;;  %v629_v24 = vsel %vm437_vm8, %v627_v21, %v625_v15 }
  0xdd   : > { %v630_v27 = vmul.f32 %v629_v24, %v2158_v18  ;;  %v631_v28 = vmul.f32 %v628_v23, %v2161_v19  ;;  %v436_v42 = vpop.permute.xlu1 %435 }
  0xdf   : > { %v682_v33 = vpack.c.bf16 %v630_v27, %v622_v20  ;;  %v683_v34 = vpack.c.bf16 %v631_v28, %v623_v26 }
  0xe1   : > { %763 = vmatpush.bf16.msra.mxu2 %v682_v33  ;;  %782 = vmatpush.bf16.msra.mxu3 %v683_v34 }
  0xe3   : > { %v434_v41 = vpop.permute.xlu0 %433 }
  0xe4   : > { %v438_v43 = vsel %vm437_vm8, %v434_v41, %v436_v42  ;;  %v439_v44 = vsel %vm437_vm8, %v436_v42, %v434_v41  ;;  %1507 = vmatmul.msk.bf16.vlgmr.msra.gmra.mxu2 %vm562_vm9, %v1529_v1  ;;  %1509 = vmatmul.msk.bf16.vlgmr.msra.gmra.mxu3 %vm562_vm9, %v1529_v1 }
  0xe5   : > { %v442_v47 = vmul.f32 %v2158_v18, %v439_v44  ;;  %v443_v48 = vmul.f32 %v2161_v19, %v438_v43 }
  0xe7   : > { %v514_v49 = vpack.c.bf16 %v442_v47, %v431_v45  ;;  %v515_v50 = vpack.c.bf16 %v443_v48, %v432_v46 }
  0xe9   : > { %583 = vmatpush.bf16.msra.mxu0 %v514_v49  ;;  %602 = vmatpush.bf16.msra.mxu1 %v515_v50 }
  0xec   : > { %1495 = vmatmul.msk.bf16.vlgmr.msra.gmra.mxu0 %vm562_vm9, %v1527_v51  ;;  %1497 = vmatmul.msk.bf16.vlgmr.msra.gmra.mxu1 %vm562_vm9, %v1527_v51 }
  0xf4   : > { %1508 = vmatmul.msk.bf16.gmra.mxu2 %vm562_vm9, %v1530_v53  ;;  %1510 = vmatmul.msk.bf16.gmra.mxu3 %vm562_vm9, %v1530_v53 }
  0xfc   : > { %1496 = vmatmul.msk.bf16.gmra.mxu0 %vm562_vm9, %v1528_v54  ;;  %1498 = vmatmul.msk.bf16.gmra.mxu1 %vm562_vm9, %v1528_v54 }
 0x114   : > { %v2215_v61 = vpop.permute.xlu2 %544 }
 0x115   : > { %v714_v58 = vpop.permute.xlu1 %713 }
 0x116   : > { %v2211_v59 = vmul.f32 %v722_v56, %v714_v58  ;;  %v2213_v60 = vmul.f32 %v723_v57, %v714_v58 }
 0x11c   : > { %v2221_v10 = vpop.permute.xlu0 %549 }
 0x11d   : > { %v535_v11 = vpop.permute.xlu1 %534 }
 0x11f   : > { %v719_v62 = vpop.permute.xlu2 %718 }
 0x120   : > { %v2217_v7 = vmul.f32 %v722_v56, %v719_v62  ;;  %v2219_v8 = vmul.f32 %v723_v57, %v719_v62 }
 0x124   : > { %v704_v12 = vpop.permute.xlu0 %703 }
 0x125   : > { %v726_v23 = vmul.f32 %v722_v56, %v704_v12  ;;  %v727_v24 = vmul.f32 %v723_v57, %v704_v12 }
 0x127   : > { %v540_v28 = vpop.permute.xlu2 %539  ;;  %v709_v38 = vpop.permute.xlu1 %708 }
 0x128   : > { %v728_v42 = vmul.f32 %v722_v56, %v709_v38  ;;  %v729_v52 = vmul.f32 %v723_v57, %v709_v38 }
 0x167   : > { %v765_v14 = vpop.f32.mrf.mxu2  ;;  %v784_v15 = vpop.f32.mrf.mxu3 }
 0x169   : > { %v585_v0 = vpop.f32.mrf.mxu0  ;;  %v604_v2 = vpop.f32.mrf.mxu1 }
 0x16a   : > { %v586_v21 = vadd.f32 %v585_v0, %v535_v11  ;;  %v605_v22 = vadd.f32 %v604_v2, %v535_v11 }
 0x16c   : > { %v766_v13 = vadd.f32 %v765_v14, %v586_v21  ;;  %v785_v20 = vadd.f32 %v784_v15, %v605_v22 }
 0x16e   : > { %v794_v26 = vadd.f32 %v766_v13, %v726_v23  ;;  %v795_v27 = vadd.f32 %v785_v20, %v727_v24 }
 0x16f   : > { %v767_v39 = vpop.f32.mrf.mxu2  ;;  %v786_v48 = vpop.f32.mrf.mxu3 }
 0x170   : > { %v1511_v29 = vmul.f32 -1.442695, %v794_v26  ;;  %v1512_v33 = vmul.f32 -1.442695, %v795_v27 }
 0x171   : > { %v587_v34 = vpop.f32.mrf.mxu0  ;;  %v606_v41 = vpop.f32.mrf.mxu1 }
 0x172   : > { %1608 = vpow2.f32 %v1511_v29  ;;  %v588_v1 = vadd.f32 %v587_v34, %v540_v28  ;;  %v607_v45 = vadd.f32 %v606_v41, %v540_v28 }
 0x173   : > { %1610 = vpow2.f32 %v1512_v33 }
 0x174   : > { %v768_v40 = vadd.f32 %v767_v39, %v588_v1  ;;  %v787_v51 = vadd.f32 %v786_v48, %v607_v45 }
 0x176   : > { %v2223_v44 = vadd.f32 %v768_v40, %v728_v42  ;;  %v2226_v53 = vadd.f32 %v787_v51, %v729_v52 }
 0x178   : > { %v1609_v43 = vpop.eup %1608  ;;  %v1513_v50 = vmul.f32 -1.442695, %v2223_v44  ;;  %v1514_v11 = vmul.f32 -1.442695, %v2226_v53 }
 0x179   : > { %v1611_v46 = vpop.eup %1610  ;;  %v826_v47 = vadd.f32 1.0, %v1609_v43  ;;  %v609_v43 = vpop.f32.mrf.mxu1 }
 0x17a   : > { %v827_v49 = vadd.f32 1.0, %v1611_v46  ;;  %v590_v45 = vpop.f32.mrf.mxu0 }
 0x17b   : > { %1612 = vrcp.f32 %v826_v47  ;;  %v845_v12 = vand.u32 2147483648, %v826_v47  ;;  %v843_v2 = vand.u32 2147483647, %v826_v47  ;;  %vm839_vm12 = vweird.f32 %v826_v47 }
 0x17c   : > { %1614 = vrcp.f32 %v827_v49  ;;  %v860_v21 = vand.u32 2147483648, %v827_v49  ;;  %v858_v57 = vand.u32 2147483647, %v827_v49  ;;  %vm854_vm14 = vweird.f32 %v827_v49 }
 0x17d   : > { %1616 = vpow2.f32 %v1513_v50  ;;  %v846_v24 = vor.u32 1.1754944e-38, %v845_v12  ;;  %vm844_vm15 = vcmp.eq.f32.partialorder %v843_v2, 8.507059e+37  ;;  %v591_v46 = vadd.f32 %v590_v45, %v2215_v61 }
 0x17e   : > { %1618 = vpow2.f32 %v1514_v11  ;;  %v861_v29 = vor.u32 1.1754944e-38, %v860_v21  ;;  %vm859_vm9 = vcmp.eq.f32.partialorder %v858_v57, 8.507059e+37 }
 0x181   : > { %v1613_v54 = vpop.eup %1612 }
 0x182   : > { %v1615_v55 = vpop.eup %1614  ;;  %v835_v56 = vmul.f32 %v1613_v54, %v826_v47  ;;  %vm840_vm10 = vweird.f32 %v1613_v54  ;;  %v789_v47 = vpop.f32.mrf.mxu3 }
 0x183   : > { %v850_v58 = vmul.f32 %v1615_v55, %v827_v49  ;;  %v1617_v15 = vpop.eup %1616  ;;  %vm855_vm11 = vweird.f32 %v1615_v55  ;;  %vm841_vm13 = vmor %vm839_vm12, %vm840_vm10  ;;  %v770_v49 = vpop.f32.mrf.mxu2 }
 0x184   : > { %v836_v62 = vsub.f32 1.0, %v835_v56  ;;  %v828_v20 = vadd.f32 1.0, %v1617_v15  ;;  %vm856_vm2 = vmor %vm854_vm14, %vm855_vm11  ;;  %v1619_v40 = vpop.eup %1618  ;;  %v771_v52 = vadd.f32 %v770_v49, %v591_v46 }
 0x185   : > { %v851_v14 = vsub.f32 1.0, %v850_v58  ;;  %v829_v41 = vadd.f32 1.0, %v1619_v40 }
 0x186   : > { %v837_v0 = vmul.f32 %v1613_v54, %v836_v62  ;;  %1620 = vrcp.f32 %v828_v20  ;;  %v875_v11 = vand.u32 2147483648, %v828_v20  ;;  %vm869_vm11 = vweird.f32 %v828_v20 }
 0x187   : > { %v852_v22 = vmul.f32 %v1615_v55, %v851_v14  ;;  %1622 = vrcp.f32 %v829_v41  ;;  %v873_v12 = vand.u32 2147483647, %v828_v20 }
 0x188   : > { %v838_v23 = vadd.f32 %v1613_v54, %v837_v0 }
 0x189   : > { %v853_v13 = vadd.f32 %v1615_v55, %v852_v22  ;;  %v890_v22 = vand.u32 2147483648, %v829_v41 }
 0x18a   : > { %v842_v28 = vsel %vm841_vm13, %v1613_v54, %v838_v23  ;;  %vm874_vm13 = vcmp.eq.f32.partialorder %v873_v12, 8.507059e+37  ;;  %v888_v23 = vand.u32 2147483647, %v829_v41 }
 0x18b   : > { %v847_v33 = vsel %vm844_vm15, %v846_v24, %v842_v28  ;;  %v857_v34 = vsel %vm856_vm2, %v1615_v55, %v853_v13  ;;  %vm884_vm15 = vweird.f32 %v829_v41  ;;  %v891_v28 = vor.u32 1.1754944e-38, %v890_v22 }
 0x18c   : > { %v2229_v1 = vmul.f32 %v847_v33, %v794_v26  ;;  %v862_v38 = vsel %vm859_vm9, %v861_v29, %v857_v34  ;;  %v1621_v42 = vpop.eup %1620  ;;  %vm889_vm9 = vcmp.eq.f32.partialorder %v888_v23, 8.507059e+37 }
 0x18d   : > { %v2231_v39 = vmul.f32 %v862_v38, %v795_v27  ;;  %v865_v26 = vmul.f32 %v1621_v42, %v828_v20  ;;  %v610_v27 = vadd.f32 %v609_v43, %v2215_v61  ;;  %v1623_v50 = vpop.eup %1622  ;;  %v2257_v61 = vadd.f32 %v771_v52, %v2211_v59  ;;  %v592_v38 = vpop.f32.mrf.mxu0 }
 0x18e   : > { %2831 = vst [vmem:[#allocation13_spill] sm:$0xff] %v2229_v1  ;;  %1026 = vrot.lane.b32.xlu1 %v2229_v1, %s1782_s22  ;;  %1058 = vrot.lane.b32.xlu0 %v2229_v1, %s1783_s28  ;;  %v880_v55 = vmul.f32 %v1623_v50, %v829_v41  ;;  %vm870_vm10 = vweird.f32 %v1621_v42  ;;  %v876_v59 = vor.u32 1.1754944e-38, %v875_v11  ;;  %vm885_vm14 = vweird.f32 %v1623_v50  ;;  %v772_v41 = vpop.f32.mrf.mxu2 }
 0x18f   : > { %2832 = vst [vmem:[#allocation14_spill] sm:$0xff] %v2231_v39  ;;  %1066 = vrot.lane.b32.xlu2 %v2231_v39, %s1783_s28  ;;  %v866_v48 = vsub.f32 1.0, %v865_v26  ;;  %v790_v51 = vadd.f32 %v789_v47, %v610_v27  ;;  %vm871_vm12 = vmor %vm869_vm11, %vm870_vm10  ;;  %v1515_v15 = vmul.f32 -1.442695, %v2257_v61  ;;  %v593_v40 = vadd.f32 %v592_v38, %v2221_v10 }
 0x190   : > { %v881_v62 = vsub.f32 1.0, %v880_v55  ;;  %vm886_vm2 = vmor %vm884_vm15, %vm885_vm14 }
 0x191   : > { %v867_v54 = vmul.f32 %v1621_v42, %v866_v48  ;;  %v2254_v56 = vadd.f32 %v790_v51, %v2213_v60  ;;  %v773_v26 = vadd.f32 %v772_v41, %v593_v40  ;;  %v791_v48 = vpop.f32.mrf.mxu3 }
 0x192   : > { %v882_v2 = vmul.f32 %v1623_v50, %v881_v62 }
 0x193   : > { %v868_v58 = vadd.f32 %v1621_v42, %v867_v54  ;;  %v1516_v14 = vmul.f32 -1.442695, %v2254_v56  ;;  %v2294_v47 = vadd.f32 %v773_v26, %v2217_v7 }
 0x194   : > { %v883_v21 = vadd.f32 %v1623_v50, %v882_v2 }
 0x195   : > { %v872_v0 = vsel %vm871_vm12, %v1621_v42, %v868_v58  ;;  %1624 = vpow2.f32 %v1516_v14  ;;  %v1517_v51 = vmul.f32 -1.442695, %v2294_v47 }
 0x196   : > { %1130 = vrot.lane.b32.xlu1 %v2229_v1, %s1779_s18  ;;  %1162 = vrot.lane.b32.xlu0 %v2229_v1, %s1780_s26  ;;  %v877_v60 = vsel %vm874_vm13, %v876_v59, %v872_v0  ;;  %1626 = vpow2.f32 %v1515_v15  ;;  %v887_v13 = vsel %vm886_vm2, %v1623_v50, %v883_v21 }
 0x197   : > { %1170 = vrot.lane.b32.xlu2 %v2231_v39, %s1780_s26  ;;  %v2268_v57 = vmul.f32 %v877_v60, %v2223_v44  ;;  %v892_v29 = vsel %vm889_vm9, %v891_v28, %v887_v13 }
 0x198   : > { %v2277_v34 = vmul.f32 %v892_v29, %v2226_v53  ;;  %v611_v53 = vpop.f32.mrf.mxu1 }
 0x199   : > { %2833 = vst [vmem:[#allocation15_spill] sm:$0xff] %v2268_v57  ;;  %v612_v46 = vadd.f32 %v611_v53, %v2221_v10 }
 0x19a   : > { %2835 = vst [vmem:[#allocation16_spill] sm:$0xff] %v2277_v34 }
 0x19b   : > { %v1625_v24 = vpop.eup %1624  ;;  %v792_v52 = vadd.f32 %v791_v48, %v612_v46 }
 0x19c   : > { %v1627_v20 = vpop.eup %1626  ;;  %v831_v44 = vadd.f32 1.0, %v1625_v24 }
 0x19d   : > { %v830_v33 = vadd.f32 1.0, %v1627_v20  ;;  %v2304_v7 = vadd.f32 %v792_v52, %v2219_v8 }
 0x19e   : > { %1002 = vrot.lane.b32.xlu1 %v2231_v39, %s1785_s29  ;;  %1034 = vrot.lane.b32.xlu0 %v2231_v39, %s1782_s22  ;;  %1628 = vrcp.f32 %v831_v44  ;;  %v920_v62 = vand.u32 2147483648, %v831_v44  ;;  %vm914_vm12 = vweird.f32 %v831_v44  ;;  %v918_v12 = vand.u32 2147483647, %v831_v44 }
 0x19f   : > { %994 = vrot.lane.b32.xlu2 %v2229_v1, %s1785_s29  ;;  %1630 = vrcp.f32 %v830_v33  ;;  %v905_v11 = vand.u32 2147483648, %v830_v33  ;;  %v1518_v14 = vmul.f32 -1.442695, %v2304_v7  ;;  %vm899_vm13 = vweird.f32 %v830_v33 }
 0x1a0   : > { %1632 = vpow2.f32 %v1517_v51  ;;  %v903_v15 = vand.u32 2147483647, %v830_v33  ;;  %v921_v59 = vor.u32 1.1754944e-38, %v920_v62  ;;  %vm919_vm2 = vcmp.eq.f32.partialorder %v918_v12, 8.507059e+37 }
 0x1a1   : > { %v906_v60 = vor.u32 1.1754944e-38, %v905_v11  ;;  %1634 = vpow2.f32 %v1518_v14 }
 0x1a2   : > { %vm904_vm9 = vcmp.eq.f32.partialorder %v903_v15, 8.507059e+37 }
 0x1a4   : > { %v1629_v42 = vpop.eup %1628 }
 0x1a5   : > { %v1631_v43 = vpop.eup %1630  ;;  %v910_v45 = vmul.f32 %v1629_v42, %v831_v44  ;;  %vm915_vm10 = vweird.f32 %v1629_v42 }
 0x1a6   : > { %1106 = vrot.lane.b32.xlu1 %v2231_v39, %s1781_s27  ;;  %1138 = vrot.lane.b32.xlu0 %v2231_v39, %s1779_s18  ;;  %v895_v27 = vmul.f32 %v1631_v43, %v830_v33  ;;  %vm900_vm11 = vweird.f32 %v1631_v43  ;;  %vm916_vm14 = vmor %vm914_vm12, %vm915_vm10  ;;  %v1633_v0 = vpop.eup %1632 }
 0x1a7   : > { %1098 = vrot.lane.b32.xlu2 %v2229_v1, %s1781_s27  ;;  %v911_v49 = vsub.f32 1.0, %v910_v45  ;;  %vm901_vm15 = vmor %vm899_vm13, %vm900_vm11  ;;  %v832_v22 = vadd.f32 1.0, %v1633_v0  ;;  %v1635_v20 = vpop.eup %1634 }
 0x1a8   : > { %v896_v50 = vsub.f32 1.0, %v895_v27  ;;  %v833_v28 = vadd.f32 1.0, %v1635_v20 }
 0x1a9   : > { %v912_v54 = vmul.f32 %v1629_v42, %v911_v49  ;;  %1636 = vrcp.f32 %v832_v22  ;;  %vm929_vm11 = vweird.f32 %v832_v22  ;;  %v933_v26 = vand.u32 2147483647, %v832_v22 }
 0x1aa   : > { %v897_v55 = vmul.f32 %v1631_v43, %v896_v50  ;;  %1638 = vrcp.f32 %v833_v28  ;;  %v950_v50 = vand.u32 2147483648, %v833_v28  ;;  %v948_v52 = vand.u32 2147483647, %v833_v28 }
 0x1ab   : > { %v913_v10 = vadd.f32 %v1629_v42, %v912_v54  ;;  %vm934_vm13 = vcmp.eq.f32.partialorder %v933_v26, 8.507059e+37 }
 0x1ac   : > { %v898_v58 = vadd.f32 %v1631_v43, %v897_v55  ;;  %v951_v55 = vor.u32 1.1754944e-38, %v950_v50 }
 0x1ad   : > { %v917_v2 = vsel %vm916_vm14, %v1629_v42, %v913_v10 }
 0x1ae   : > { %1060 = vrot.lane.b32.xlu1 %v2268_v57, %s1783_s28  ;;  %962 = vrot.lane.b32.xlu0 %v2229_v1, %s2834_s30  ;;  %v902_v8 = vsel %vm901_vm15, %v1631_v43, %v898_v58  ;;  %v922_v21 = vsel %vm919_vm2, %v921_v59, %v917_v2  ;;  %v935_v43 = vand.u32 2147483648, %v832_v22  ;;  %vm944_vm15 = vweird.f32 %v833_v28 }
 0x1af   : > { %970 = vrot.lane.b32.xlu2 %v2231_v39, %s2834_s30  ;;  %v907_v23 = vsel %vm904_vm9, %v906_v60, %v902_v8  ;;  %v2314_v24 = vmul.f32 %v922_v21, %v2254_v56  ;;  %v1637_v29 = vpop.eup %1636  ;;  %vm949_vm9 = vcmp.eq.f32.partialorder %v948_v52, 8.507059e+37 }
 0x1b0   : > { %v2317_v13 = vmul.f32 %v907_v23, %v2257_v61  ;;  %v925_v44 = vmul.f32 %v1637_v29, %v832_v22  ;;  %v1639_v61 = vpop.eup %1638  ;;  %vm930_vm10 = vweird.f32 %v1637_v29  ;;  %v936_v27 = vor.u32 1.1754944e-38, %v935_v43 }
 0x1b1   : > { %2836 = vst [vmem:[#allocation17_spill] sm:$0xff] %v2314_v24  ;;  %v940_v38 = vmul.f32 %v1639_v61, %v833_v28  ;;  %vm931_vm12 = vmor %vm929_vm11, %vm930_vm10  ;;  %vm945_vm14 = vweird.f32 %v1639_v61 }
 0x1b2   : > { %2837 = vst [vmem:[#allocation18_spill] sm:$0xff] %v2317_v13  ;;  %v926_v56 = vsub.f32 1.0, %v925_v44  ;;  %vm946_vm2 = vmor %vm944_vm15, %vm945_vm14 }
 0x1b3   : > { %v941_v42 = vsub.f32 1.0, %v940_v38 }
 0x1b4   : > { %v927_v33 = vmul.f32 %v1637_v29, %v926_v56 }
 0x1b5   : > { %v942_v45 = vmul.f32 %v1639_v61, %v941_v42 }
 0x1b6   : > { %1164 = vrot.lane.b32.xlu1 %v2268_v57, %s1780_s26  ;;  %1068 = vrot.lane.b32.xlu0 %v2277_v34, %s1783_s28  ;;  %v928_v41 = vadd.f32 %v1637_v29, %v927_v33 }
 0x1b7   : > { %1028 = vrot.lane.b32.xlu2 %v2268_v57, %s1782_s22  ;;  %v943_v49 = vadd.f32 %v1639_v61, %v942_v45 }
 0x1b8   : > { %v932_v53 = vsel %vm931_vm12, %v1637_v29, %v928_v41 }
 0x1b9   : > { %v937_v46 = vsel %vm934_vm13, %v936_v27, %v932_v53  ;;  %v947_v54 = vsel %vm946_vm2, %v1639_v61, %v943_v49 }
 0x1ba   : > { %v2344_v51 = vmul.f32 %v937_v46, %v2294_v47  ;;  %v952_v10 = vsel %vm949_vm9, %v951_v55, %v947_v54 }
 0x1bb   : > { %v2353_v47 = vmul.f32 %v952_v10, %v2304_v7 }
 0x1bc   : > { %2838 = vst [vmem:[#allocation19_spill] sm:$0xff] %v2344_v51 }
 0x1bd   : > { %2839 = vst [vmem:[#allocation20_spill] sm:$0xff] %v2353_v47 }
 0x1be   : > { %1036 = vrot.lane.b32.xlu1 %v2277_v34, %s1782_s22  ;;  %1172 = vrot.lane.b32.xlu0 %v2277_v34, %s1780_s26 }
 0x1bf   : > { %1132 = vrot.lane.b32.xlu2 %v2268_v57, %s1779_s18 }
 0x1c6   : > { %1140 = vrot.lane.b32.xlu1 %v2277_v34, %s1779_s18  ;;  %996 = vrot.lane.b32.xlu0 %v2268_v57, %s1785_s29 }
 0x1c7   : > { %1004 = vrot.lane.b32.xlu2 %v2277_v34, %s1785_s29 }
 0x1ce   : > { %964 = vrot.lane.b32.xlu1 %v2268_v57, %s2834_s30  ;;  %1100 = vrot.lane.b32.xlu0 %v2268_v57, %s1781_s27 }
 0x1cf   : > { %1108 = vrot.lane.b32.xlu2 %v2277_v34, %s1781_s27 }
 0x1d6   : > { %1070 = vrot.lane.b32.xlu1 %v2314_v24, %s1783_s28  ;;  %1174 = vrot.lane.b32.xlu0 %v2314_v24, %s1780_s26 }
 0x1d7   : > { %1062 = vrot.lane.b32.xlu2 %v2317_v13, %s1783_s28 }
 0x1de   : > { %1166 = vrot.lane.b32.xlu1 %v2317_v13, %s1780_s26  ;;  %998 = vrot.lane.b32.xlu0 %v2317_v13, %s1785_s29 }
 0x1df   : > { %1030 = vrot.lane.b32.xlu2 %v2317_v13, %s1782_s22 }
 0x1e6   : > { %1038 = vrot.lane.b32.xlu1 %v2314_v24, %s1782_s22  ;;  %1102 = vrot.lane.b32.xlu0 %v2317_v13, %s1781_s27 }
 0x1e7   : > { %1134 = vrot.lane.b32.xlu2 %v2317_v13, %s1779_s18 }
 0x1e9   : > { %v1067_v40 = vpop.permute.xlu2 %1066 }
 0x1ee   : > { %1142 = vrot.lane.b32.xlu1 %v2314_v24, %s1779_s18  ;;  %974 = vrot.lane.b32.xlu0 %v2314_v24, %s2834_s30 }
 0x1ef   : > { %1006 = vrot.lane.b32.xlu2 %v2314_v24, %s1785_s29 }
 0x1f1   : > { %v1171_v48 = vpop.permute.xlu2 %1170 }
 0x1f6   : > { %966 = vrot.lane.b32.xlu1 %v2317_v13, %s2834_s30  ;;  %1064 = vrot.lane.b32.xlu0 %v2344_v51, %s1783_s28 }
 0x1f7   : > { %1110 = vrot.lane.b32.xlu2 %v2314_v24, %s1781_s27 }
 0x1f9   : > { %v995_v58 = vpop.permute.xlu2 %994 }
 0x1fe   : > { %1176 = vrot.lane.b32.xlu1 %v2353_v47, %s1780_s26  ;;  %1032 = vrot.lane.b32.xlu0 %v2344_v51, %s1782_s22 }
 0x1ff   : > { %1072 = vrot.lane.b32.xlu2 %v2353_v47, %s1783_s28 }
 0x200   : > { %v1027_v62 = vpop.permute.xlu1 %1026  ;;  %v1059_v11 = vpop.permute.xlu0 %1058 }
 0x201   : > { %v1099_v12 = vpop.permute.xlu2 %1098  ;;  %v1074_v14 = vsel %vm459_vm6, %v1059_v11, %v1067_v40  ;;  %v1078_v15 = vsel %vm459_vm6, %v1067_v40, %v1059_v11 }
 0x202   : > { %v2432_v52 = vmul.f32 %v1078_v15, %v2112_v36  ;;  %v2435_v54 = vmul.f32 %v1074_v14, %v2115_v37 }
 0x206   : > { %1000 = vrot.lane.b32.xlu1 %v2344_v51, %s1785_s29  ;;  %1136 = vrot.lane.b32.xlu0 %v2344_v51, %s1779_s18 }
 0x207   : > { %1168 = vrot.lane.b32.xlu2 %v2344_v51, %s1780_s26  ;;  %s2840_s26 = smov 111  }
 0x208   : > { %v1131_v7 = vpop.permute.xlu1 %1130  ;;  %v1163_v0 = vpop.permute.xlu0 %1162 }
 0x209   : > { %v971_v2 = vpop.permute.xlu2 %970  ;;  %v1178_v8 = vsel %vm496_vm3, %v1163_v0, %v1171_v48  ;;  %v1182_v59 = vsel %vm496_vm3, %v1171_v48, %v1163_v0 }
 0x20a   : > { %v2454_v11 = vmul.f32 %v1178_v8, %v2033_v31 }
 0x20e   : > { %1104 = vrot.lane.b32.xlu1 %v2344_v51, %s1781_s27  ;;  %1008 = vrot.lane.b32.xlu0 %v2353_v47, %s1785_s29 }
 0x20f   : > { %1040 = vrot.lane.b32.xlu2 %v2353_v47, %s1782_s22 }
 0x210   : > { %v1003_v60 = vpop.permute.xlu1 %1002  ;;  %v1035_v21 = vpop.permute.xlu0 %1034 }
 0x211   : > { %v1029_v22 = vpop.permute.xlu2 %1028  ;;  %v1010_v23 = vsel %vm437_vm8, %v995_v58, %v1003_v60  ;;  %v1014_v20 = vsel %vm437_vm8, %v1003_v60, %v995_v58  ;;  %v1042_v28 = vsel %vm448_vm5, %v1027_v62, %v1035_v21  ;;  %v1046_v29 = vsel %vm448_vm5, %v1035_v21, %v1027_v62 }
 0x212   : > { %v2460_v14 = vmul.f32 %v1046_v29, %v2105_v3  ;;  %v2463_v15 = vmul.f32 %v1042_v28, %v2108_v35 }
 0x216   : > { %976 = vrot.lane.b32.xlu1 %v2353_v47, %s2834_s30  ;;  %1112 = vrot.lane.b32.xlu0 %v2353_v47, %s1781_s27 }
 0x217   : > { %1144 = vrot.lane.b32.xlu2 %v2353_v47, %s1779_s18  ;;  %s400_s18 = scalar_lea.vmem [#allocation7], %s1482_s12  ;;  %s1722_s12 = scalar_lea.hbm %s2806_s10, 32 }
 0x218   : > { %v1107_v44 = vpop.permute.xlu1 %1106  ;;  %v1139_v56 = vpop.permute.xlu0 %1138  ;;  %s1378_s27 = sshll.u32 %s400_s18, 4  ;;  %s1379_s27 = int_to_ptr.vmem [resolvable:$true] %s1378_s27 }
 0x219   : > { %v1133_v61 = vpop.permute.xlu2 %1132  ;;  %v2397_v33 = vsel %vm474_vm4, %v1099_v12, %v1107_v44  ;;  %v2401_v38 = vsel %vm474_vm4, %v1107_v44, %v1099_v12  ;;  %v1146_v40 = vsel %vm485_vm1, %v1131_v7, %v1139_v56  ;;  %v1150_v41 = vsel %vm485_vm1, %v1139_v56, %v1131_v7 }
 0x21a   : > { %v2457_v12 = vmul.f32 %v1182_v59, %v2036_v32 }
 0x21e   : > { %1198 = vrot.lane.b32.xlu1 %v2317_v13, %s2840_s26  ;;  %972 = vrot.lane.b32.xlu0 %v2277_v34, %s2834_s30 }
 0x21f   : > { %968 = vrot.lane.b32.xlu2 %v2344_v51, %s2834_s30 }
 0x220   : > { %v1061_v42 = vpop.permute.xlu1 %1060  ;;  %v963_v43 = vpop.permute.xlu0 %962 }
 0x221   : > { %v1005_v26 = vpop.permute.xlu2 %1004  ;;  %v2415_v53 = vsel %vm426_vm7, %v963_v43, %v971_v2  ;;  %v2419_v45 = vsel %vm426_vm7, %v971_v2, %v963_v43 }
 0x222   : > { %2841 = vst [vmem:[#allocation21_spill] sm:$0xff] %v2415_v53 }
 0x223   : > { %2842 = vst [vmem:[#allocation22_spill] sm:$0xff] %v2419_v45 }
 0x226   : > { %1208 = vrot.lane.b32.xlu1 %v2353_v47, %s2840_s26  ;;  %1206 = vrot.lane.b32.xlu0 %v2314_v24, %s2840_s26 }
 0x227   : > { %1194 = vrot.lane.b32.xlu2 %v2229_v1, %s2840_s26 }
 0x228   : > { %v1165_v27 = vpop.permute.xlu1 %1164  ;;  %v1069_v46 = vpop.permute.xlu0 %1068 }
 0x229   : > { %v1109_v48 = vpop.permute.xlu2 %1108  ;;  %v1075_v49 = vsel %vm459_vm6, %v1061_v42, %v1069_v46  ;;  %v1079_v50 = vsel %vm459_vm6, %v1069_v46, %v1061_v42 }
 0x22a   : > { %v2438_v55 = vmul.f32 %v1079_v50, %v2112_v36  ;;  %v2441_v10 = vmul.f32 %v1075_v49, %v2115_v37  ;;  %v2499_v49 = vmul.f32 %v1014_v20, %v2158_v18  ;;  %v2502_v50 = vmul.f32 %v1010_v23, %v2161_v19 }
 0x22e   : > { %1202 = vrot.lane.b32.xlu1 %v2231_v39, %s2840_s26  ;;  %1196 = vrot.lane.b32.xlu0 %v2268_v57, %s2840_s26 }
 0x22f   : > { %1200 = vrot.lane.b32.xlu2 %v2344_v51, %s2840_s26 }
 0x230   : > { %v1037_v7 = vpop.permute.xlu1 %1036  ;;  %v1173_v0 = vpop.permute.xlu0 %1172 }
 0x231   : > { %v1063_v2 = vpop.permute.xlu2 %1062  ;;  %v1043_v60 = vsel %vm448_vm5, %v1029_v22, %v1037_v7  ;;  %v1047_v21 = vsel %vm448_vm5, %v1037_v7, %v1029_v22  ;;  %v1179_v8 = vsel %vm496_vm3, %v1165_v27, %v1173_v0  ;;  %v1183_v59 = vsel %vm496_vm3, %v1173_v0, %v1165_v27  ;;  %v1264_v22 = vld [vmem:[%s2805_s9] sm:$0x1f] }
 0x232   : > { %v2474_v29 = vmul.f32 %v1047_v21, %v2105_v3  ;;  %v2477_v28 = vmul.f32 %v1043_v60, %v2108_v35  ;;  %v2480_v44 = vmul.f32 %v1179_v8, %v2033_v31  ;;  %v2483_v56 = vmul.f32 %v1183_v59, %v2036_v32 }
 0x233   : > { %v2505_v7 = vmul.f32 %v1146_v40, %v2026_v25  ;;  %v2508_v0 = vmul.f32 %v1150_v41, %v2029_v30 }
 0x236   : > { %1267 = vperm.xlu0 %1604, %v1264_v22  }
 0x237   : > { %1204 = vrot.lane.b32.xlu2 %v2277_v34, %s2840_s26  ;;  %s1376_s26 = scalar_lea.hbm %s2806_s10, %s1531_s11 }
 0x238   : > { %v1141_v60 = vpop.permute.xlu1 %1140  ;;  %v997_v21 = vpop.permute.xlu0 %996  ;;  %s1380_s22 = sshll.u32 %s1376_s26, 4  ;;  %s1381_s22 = int_to_ptr.hbm [resolvable:$true] %s1380_s22 }
 0x239   : > { %v1031_v8 = vpop.permute.xlu2 %1030  ;;  %v1147_v59 = vsel %vm485_vm1, %v1133_v61, %v1141_v60  ;;  %v1151_v22 = vsel %vm485_vm1, %v1141_v60, %v1133_v61  ;;  %v1011_v20 = vsel %vm437_vm8, %v997_v21, %v1005_v26  ;;  %v1015_v23 = vsel %vm437_vm8, %v1005_v26, %v997_v21  ;;  %s1716_s28 = sshra.s32 %s1381_s22, 4  ;;  %s1717_s28 = int_to_ptr.hbm [resolvable:$true] %s1716_s28 }
 0x23a   : > { %v2519_v40 = vmul.f32 %v1147_v59, %v2026_v25  ;;  %v2522_v41 = vmul.f32 %v1151_v22, %v2029_v30  ;;  %v2525_v46 = vmul.f32 %v1015_v23, %v2158_v18  ;;  %v2528_v27 = vmul.f32 %v1011_v20, %v2161_v19  ;;  %s1718_s29 = scalar_lea.hbm %s1717_s28, 16  ;;  %p1723_p4 = scmp.lt.s32.totalorder %s1717_s28, %s2806_s10 }
 0x23b   : > { %v2548_v60 = vmul.f32 %v2397_v33, %v2071_v5  ;;  %v2552_v26 = vmul.f32 %v2401_v38, %v2074_v6  ;;  %p1719_p1 = scmp.ne.s32.totalorder %s1717_s28, %s1718_s29  ;;  %p1724_p7 = scmp.lt.s32.totalorder %s1722_s12, %s1718_s29 }
 0x23d   : > { %2844 = vst [vmem:[#allocation24_spill] sm:$0xff] %v2548_v60  ;;  %p1720_p2 = pnand %p1719_p1, %p1880_p5  ;;  %p1725_p8 = por %p1724_p7, %p1723_p4 }
 0x23e   : > { %2845 = vst [vmem:[#allocation25_spill] sm:$0xff] %v2552_v26 }
 0x23f   : > { %p1721_p3 = pneg %p1720_p2 }
 0x240   : > { %v2538_v59 = vpop.permute.xlu1 %964  ;;  %v1101_v22 = vpop.permute.xlu0 %1100 }
 0x241   : > { %2843 = vst [vmem:[#allocation23_spill] sm:$0xff] %v2538_v59  ;;  %v2540_v23 = vpop.permute.xlu2 %1134  ;;  %v1115_v20 = vsel %vm474_vm4, %v1101_v22, %v1109_v48  ;;  %v1119_v61 = vsel %vm474_vm4, %v1109_v48, %v1101_v22  ;;  %p1726_p9 = pnand %p1725_p8, %p1721_p3 }
 0x242   : > { %v2555_v21 = vmul.f32 %v1115_v20, %v2071_v5  ;;  %v2558_v43 = vmul.f32 %v1119_v61, %v2074_v6 }
 0x244   : > { %2846 = vst [vmem:[#allocation26_spill] sm:$0xff] %v2555_v21 }
 0x245   : > { %2847 = vst [vmem:[#allocation27_spill] sm:$0xff] %v2558_v43 }
 0x248   : > { %v1071_v22 = vpop.permute.xlu1 %1070  ;;  %v1175_v62 = vpop.permute.xlu0 %1174 }
 0x249   : > { %v2564_v33 = vpop.permute.xlu2 %1006  ;;  %v1076_v48 = vsel %vm459_vm6, %v1063_v2, %v1071_v22  ;;  %v1080_v24 = vsel %vm459_vm6, %v1071_v22, %v1063_v2 }
 0x24a   : > { %v1086_v53 = vmul.f32 %v1080_v24, %v2112_v36  ;;  %v1087_v45 = vmul.f32 %v1076_v48, %v2115_v37  ;;  %v2848_v48 = vpack.c.bf16 %v2438_v55, %v2432_v52 }
 0x250   : > { %v1167_v58 = vpop.permute.xlu1 %1166  ;;  %v2566_v39 = vpop.permute.xlu0 %998 }
 0x251   : > { %v2568_v38 = vpop.permute.xlu2 %1110  ;;  %v1180_v2 = vsel %vm496_vm3, %v1167_v58, %v1175_v62  ;;  %v1184_v22 = vsel %vm496_vm3, %v1175_v62, %v1167_v58 }
 0x258   : > { %v1039_v20 = vpop.permute.xlu1 %1038  ;;  %v2570_v1 = vpop.permute.xlu0 %1102 }
 0x259   : > { %v1073_v61 = vpop.permute.xlu2 %1072  ;;  %v1044_v13 = vsel %vm448_vm5, %v1031_v8, %v1039_v20  ;;  %v1048_v24 = vsel %vm448_vm5, %v1039_v20, %v1031_v8 }
 0x260   : > { %v1143_v34 = vpop.permute.xlu1 %1142  ;;  %v2572_v57 = vpop.permute.xlu0 %974 }
 0x261   : > { %v1169_v42 = vpop.permute.xlu2 %1168 }
 0x268   : > { %v2578_v26 = vpop.permute.xlu1 %966  ;;  %v1065_v43 = vpop.permute.xlu0 %1064 }
 0x269   : > { %v1077_v60 = vsel %vm459_vm6, %v1065_v43, %v1073_v61  ;;  %v1081_v21 = vsel %vm459_vm6, %v1073_v61, %v1065_v43  ;;  %v1041_v43 = vpop.permute.xlu2 %1040 }
 0x26a   : > { %v1088_v47 = vmul.f32 %v1081_v21, %v2112_v36  ;;  %v1089_v4 = vmul.f32 %v1077_v60, %v2115_v37  ;;  %v1190_v36 = vmul.f32 %v1180_v2, %v2033_v31  ;;  %v1191_v37 = vmul.f32 %v1184_v22, %v2036_v32 }
 0x26c   : > { %v1240_v59 = vpack.c.bf16 %v1088_v47, %v1086_v53  ;;  %v1241_v51 = vpack.c.bf16 %v1089_v4, %v1087_v45  ;;  %v1054_v4 = vmul.f32 %v1048_v24, %v2105_v3  ;;  %v1055_v47 = vmul.f32 %v1044_v13, %v2108_v35 }
 0x26e   : > { %1284 = vmatpush.bf16.msrb.mxu2 %v1240_v59  ;;  %1323 = vmatpush.bf16.msrb.mxu3 %v1241_v51 }
 0x270   : > { %v1177_v53 = vpop.permute.xlu1 %1176  ;;  %v1033_v45 = vpop.permute.xlu0 %1032 }
 0x271   : > { %v1181_v58 = vsel %vm496_vm3, %v1169_v42, %v1177_v53  ;;  %v1185_v62 = vsel %vm496_vm3, %v1177_v53, %v1169_v42  ;;  %v1045_v8 = vsel %vm448_vm5, %v1033_v45, %v1041_v43  ;;  %v1049_v51 = vsel %vm448_vm5, %v1041_v43, %v1033_v45 }
 0x272   : > { %v1192_v60 = vmul.f32 %v1181_v58, %v2033_v31  ;;  %v1193_v21 = vmul.f32 %v1185_v62, %v2036_v32  ;;  %v1056_v13 = vmul.f32 %v1049_v51, %v2105_v3  ;;  %v1057_v59 = vmul.f32 %v1045_v8, %v2108_v35  ;;  %1285 = vmatpush.bf16.msrb.mxu2 %v2848_v48  ;;  %v1145_v3 = vpop.permute.xlu2 %1144 }
 0x273   : > { %v2849_v42 = vpack.c.bf16 %v2441_v10, %v2435_v54  ;;  %v1148_v31 = vsel %vm485_vm1, %v2540_v23, %v1143_v34  ;;  %v1152_v32 = vsel %vm485_vm1, %v1143_v34, %v2540_v23  ;;  %v2850_v34 = vpack.c.bf16 %v2474_v29, %v2460_v14 }
 0x274   : > { %v1236_v20 = vpack.c.bf16 %v1056_v13, %v1054_v4  ;;  %v1256_v61 = vpack.c.bf16 %v1192_v60, %v1190_v36  ;;  %v1237_v2 = vpack.c.bf16 %v1057_v59, %v1055_v47  ;;  %v1257_v22 = vpack.c.bf16 %v1193_v21, %v1191_v37 }
 0x275   : > { %1324 = vmatpush.bf16.msrb.mxu3 %v2849_v42  ;;  %v1158_v54 = vmul.f32 %v1148_v31, %v2026_v25  ;;  %v1159_v24 = vmul.f32 %v1152_v32, %v2029_v30  ;;  %v2851_v23 = vpack.c.bf16 %v2480_v44, %v2454_v11  ;;  %v2852_v37 = vpack.c.bf16 %v2477_v28, %v2463_v15 }
 0x276   : > { %1286 = vmatpush.bf16.msrb.mxu2 %v1236_v20  ;;  %1297 = vmatpush.bf16.msrb.mxu1 %v1256_v61  ;;  %v2853_v4 = vpack.c.bf16 %v2483_v56, %v2457_v12  ;;  %v1016_v11 = vsel %vm437_vm8, %v2564_v33, %v2566_v39  ;;  %v1116_v8 = vsel %vm474_vm4, %v2570_v1, %v2568_v38 }
 0x277   : > { %1336 = vmatpush.bf16.msrb.mxu0 %v1257_v22  ;;  %v1022_v44 = vmul.f32 %v1016_v11, %v2158_v18  ;;  %v2856_v20 = vpack.c.bf16 %v2525_v46, %v2499_v49  ;;  %v2858_v46 = vld [vmem:[#allocation18_spill] sm:$0xff]  ;;  %v2866_v11 = vld [vmem:[#allocation24_spill] sm:$0xff] }
 0x278   : > { %v1001_v35 = vpop.permute.xlu1 %1000  ;;  %v1137_v52 = vpop.permute.xlu0 %1136  ;;  %v1094_v49 = vmul.f32 %v2858_v46, %v2063_v63 }
 0x279   : > { %1325 = vmatpush.bf16.msrb.mxu3 %v1237_v2  ;;  %v1149_v55 = vsel %vm485_vm1, %v1137_v52, %v1145_v3  ;;  %v1153_v10 = vsel %vm485_vm1, %v1145_v3, %v1137_v52  ;;  %v2857_v2 = vpack.c.bf16 %v2528_v27, %v2502_v50  ;;  %v2859_v52 = vld [vmem:[#allocation19_spill] sm:$0xff]  ;;  %vm1280_vm1 = vcmask 261120  }
 0x27a   : > { %v1160_v43 = vmul.f32 %v1149_v55, %v2026_v25  ;;  %v1161_v36 = vmul.f32 %v1153_v10, %v2029_v30  ;;  %1287 = vmatpush.bf16.msrb.mxu2 %v2850_v34  ;;  %1298 = vmatpush.bf16.msrb.mxu1 %v2851_v23  ;;  %v1012_v30 = vsel %vm437_vm8, %v2566_v39, %v2564_v33  ;;  %v969_v29 = vpop.permute.xlu2 %968  ;;  %v2860_v55 = vld [vmem:[#allocation23_spill] sm:$0xff]  ;;  %v2861_v10 = vld [vmem:[#allocation12_spill] sm:$0xff]  ;;  %v2863_v34 = vld [vmem:[#allocation22_spill] sm:$0xff] }
 0x27b   : > { %1337 = vmatpush.bf16.msrb.mxu0 %v2853_v4  ;;  %v1023_v56 = vmul.f32 %v1012_v30, %v2161_v19  ;;  %v2854_v39 = vpack.c.bf16 %v2519_v40, %v2505_v7  ;;  %v2855_v33 = vpack.c.bf16 %v2522_v41, %v2508_v0  ;;  %v984_v7 = vsel %vm426_vm7, %v2572_v57, %v2578_v26  ;;  %v2865_v30 = vld [vmem:[#allocation26_spill] sm:$0xff] }
 0x27c   : > { %v1252_v47 = vpack.c.bf16 %v1160_v43, %v1158_v54  ;;  %v1253_v25 = vpack.c.bf16 %v1161_v36, %v1159_v24  ;;  %v1126_v0 = vmul.f32 %v1116_v8, %v2071_v5  ;;  %v990_v41 = vmul.f32 %v984_v7, %v2151_v16  ;;  %v2862_v24 = vld [vmem:[#allocation20_spill] sm:$0xff] }
 0x27d   : > { %1326 = vmatpush.bf16.msrb.mxu3 %v2852_v37  ;;  %v1096_v54 = vmul.f32 %v2859_v52, %v2063_v63  ;;  %v1097_v43 = vmul.f32 %v2862_v24, %v2861_v10  ;;  %v986_v23 = vmul.f32 %v2863_v34, %v2151_v16  ;;  %v2864_v37 = vld [vmem:[#allocation21_spill] sm:$0xff] }
 0x27e   : > { %1299 = vmatpush.bf16.msrb.mxu1 %v1252_v47  ;;  %v987_v4 = vmul.f32 %v2864_v37, %v2154_v17 }
 0x27f   : > { %1338 = vmatpush.bf16.msrb.mxu0 %v1253_v25 }
 0x280   : > { %v1105_v14 = vpop.permute.xlu1 %1104  ;;  %v1009_v15 = vpop.permute.xlu0 %1008 }
 0x281   : > { %v1013_v12 = vsel %vm437_vm8, %v1001_v35, %v1009_v15  ;;  %v1017_v28 = vsel %vm437_vm8, %v1009_v15, %v1001_v35  ;;  %v1262_v35 = vld [vmem:[#allocation5] sm:$0x77] }
 0x282   : > { %v1024_v53 = vmul.f32 %v1017_v28, %v2158_v18  ;;  %v1025_v45 = vmul.f32 %v1013_v12, %v2161_v19  ;;  %1300 = vmatpush.bf16.msrb.mxu1 %v2854_v39  ;;  %v1120_v18 = vsel %vm474_vm4, %v2568_v38, %v2570_v1  ;;  %v980_v19 = vsel %vm426_vm7, %v2578_v26, %v2572_v57  ;;  %v2701_v61 = vpop.permute.xlu2 %1194  ;;  %v2868_v15 = vld [vmem:[#allocation27_spill] sm:$0xff]  ;;  %v2871_v28 = vld [vmem:[#allocation17_spill] sm:$0xff] }
 0x283   : > { %1339 = vmatpush.bf16.msrb.mxu0 %v2855_v33  ;;  %v1127_v40 = vmul.f32 %v1120_v18, %v2074_v6  ;;  %v991_v1 = vmul.f32 %v980_v19, %v2154_v17  ;;  %v1272_v36 = vunpack.c.l.b16 %v1262_v35  ;;  %v1244_v33 = vpack.c.bf16 %v1096_v54, %v1094_v49  ;;  %v2874_v19 = vld [vmem:[#allocation13_spill] sm:$0xff] }
 0x284   : > { %v1232_v58 = vpack.c.bf16 %v1024_v53, %v1022_v44  ;;  %v1233_v62 = vpack.c.bf16 %v1025_v45, %v1023_v56  ;;  %v1095_v44 = vmul.f32 %v2871_v28, %v2861_v10  ;;  %v2872_v56 = vld [vmem:[#allocation15_spill] sm:$0xff]  ;;  %v2873_v45 = vld [vmem:[#allocation16_spill] sm:$0xff]  ;;  %v1090_v7 = vmul.f32 %v2874_v19, %v2063_v63 }
 0x285   : > { %v1092_v53 = vmul.f32 %v2872_v56, %v2063_v63  ;;  %v1093_v39 = vmul.f32 %v2873_v45, %v2861_v10  ;;  %v1275_v18 = vpack.c.b16 %v1272_v36, %v1272_v36 }
 0x286   : > { %1288 = vmatpush.bf16.msrb.mxu2 %v1232_v58  ;;  %1327 = vmatpush.bf16.msrb.mxu3 %v1233_v62  ;;  %v1273_v58 = vunpack.c.h.b16 %v1262_v35  ;;  %v1245_v8 = vpack.c.bf16 %v1097_v43, %v1095_v44 }
 0x288   : > { %v977_v38 = vpop.permute.xlu1 %976  ;;  %v1113_v51 = vpop.permute.xlu0 %1112 }
 0x289   : > { %v981_v60 = vsel %vm426_vm7, %v969_v29, %v977_v38  ;;  %v985_v21 = vsel %vm426_vm7, %v977_v38, %v969_v29  ;;  %v1117_v57 = vsel %vm474_vm4, %v1105_v14, %v1113_v51  ;;  %v1121_v26 = vsel %vm474_vm4, %v1113_v51, %v1105_v14  ;;  %v2869_v29 = vld [vmem:[#allocation25_spill] sm:$0xff] }
 0x28a   : > { %v992_v13 = vmul.f32 %v985_v21, %v2151_v16  ;;  %v993_v59 = vmul.f32 %v981_v60, %v2154_v17  ;;  %v1128_v48 = vmul.f32 %v1117_v57, %v2071_v5  ;;  %v1129_v42 = vmul.f32 %v1121_v26, %v2074_v6  ;;  %1289 = vmatpush.bf16.msrb.mxu2 %v2856_v20  ;;  %v1201_v62 = vpop.permute.xlu2 %1200 }
 0x28b   : > { %1328 = vmatpush.bf16.msrb.mxu3 %v2857_v2  ;;  %v2867_v14 = vpack.c.bf16 %v2865_v30, %v2866_v11  ;;  %v2870_v12 = vpack.c.bf16 %v2868_v15, %v2869_v29  ;;  %v1242_v38 = vpack.c.bf16 %v1092_v53, %v1090_v7  ;;  %v1276_v60 = vpack.c.b16 %v1273_v58, %v1273_v58 }
 0x28c   : > { %v1228_v22 = vpack.c.bf16 %v992_v13, %v990_v41  ;;  %v1248_v31 = vpack.c.bf16 %v1128_v48, %v1126_v0  ;;  %v1229_v32 = vpack.c.bf16 %v993_v59, %v991_v1  ;;  %v1249_v3 = vpack.c.bf16 %v1129_v42, %v1127_v40  ;;  %v2875_v0 = vld [vmem:[#allocation14_spill] sm:$0xff]  ;;  %v1641_v48 = vld [vmem:[%s2798_s2 + $0x18] ss:$0 sm:$0xff] }
 0x28d   : > { %v1091_v40 = vmul.f32 %v2875_v0, %v2861_v10  ;;  %v1640_v13 = vld [vmem:[%s2798_s2 + $0x10] ss:$0 sm:$0xff] }
 0x28e   : > { %1290 = vmatpush.bf16.msrb.mxu2 %v1228_v22  ;;  %1301 = vmatpush.bf16.msrb.mxu1 %v1248_v31 }
 0x28f   : > { %1329 = vmatpush.bf16.msrb.mxu3 %v1229_v32  ;;  %1340 = vmatpush.bf16.msrb.mxu0 %v1249_v3  ;;  %v1243_v51 = vpack.c.bf16 %v1093_v39, %v1091_v40  ;;  %v1263_v32 = vld [vmem:[#allocation5 + $0x8] sm:$0x7] }
 0x290   : > { %v1199_v5 = vpop.permute.xlu1 %1198  ;;  %v973_v6 = vpop.permute.xlu0 %972 }
 0x291   : > { %v979_v27 = vsel %vm426_vm7, %v2860_v55, %v973_v6  ;;  %v983_v50 = vsel %vm426_vm7, %v973_v6, %v2860_v55  ;;  %v1274_v6 = vunpack.c.l.b16 %v1263_v32 }
 0x292   : > { %v988_v47 = vmul.f32 %v983_v50, %v2151_v16  ;;  %v989_v25 = vmul.f32 %v979_v27, %v2154_v17  ;;  %1302 = vmatpush.bf16.msrb.mxu1 %v2867_v14  ;;  %v1205_v3 = vpop.permute.xlu2 %1204 }
 0x293   : > { %1341 = vmatpush.bf16.msrb.mxu0 %v2870_v12  ;;  %v1277_v36 = vpack.c.b16 %v1274_v6, %v1274_v6 }
 0x294   : > { %v1226_v16 = vpack.c.bf16 %v988_v47, %v986_v23  ;;  %v1227_v17 = vpack.c.bf16 %v989_v25, %v987_v4 }
 0x296   : > { %1291 = vmatpush.bf16.msrb.mxu2 %v1226_v16  ;;  %1303 = vmatpush.bf16.msrb.mxu1 %v1244_v33 }
 0x297   : > { %1330 = vmatpush.bf16.msrb.mxu3 %v1227_v17  ;;  %1342 = vmatpush.bf16.msrb.mxu0 %v1245_v8 }
 0x298   : > { %v1209_v41 = vpop.permute.xlu1 %1208  ;;  %v1207_v1 = vpop.permute.xlu0 %1206 }
 0x299   : > { %v1213_v21 = vsel %vm507_vm0, %v1201_v62, %v1209_v41  ;;  %v1217_v57 = vsel %vm507_vm0, %v1209_v41, %v1201_v62  ;;  %v1212_v26 = vsel %vm507_vm0, %v1199_v5, %v1207_v1  ;;  %v1216_v63 = vsel %vm507_vm0, %v1207_v1, %v1199_v5  ;;  %1292 = vmatmul.bf16.vlgmr.msrb.gmra.mxu2 %v1275_v18 }
 0x29a   : > { %v1224_v59 = vmul.f32 %v1640_v13, %v1213_v21  ;;  %v1225_v42 = vmul.f32 %v1641_v48, %v1217_v57  ;;  %v1222_v20 = vmul.f32 %v1640_v13, %v1212_v26  ;;  %v1223_v2 = vmul.f32 %v1641_v48, %v1216_v63  ;;  %1331 = vmatmul.bf16.vlgmr.msrb.gmra.mxu3 %v1275_v18 }
 0x29b   : > { %1304 = vmatpush.bf16.msrb.mxu1 %v1242_v38  ;;  %1343 = vmatpush.bf16.msrb.mxu0 %v1243_v51 }
 0x29c   : > { %v1260_v22 = vpack.c.bf16 %v1224_v59, %v1222_v20  ;;  %v1261_v31 = vpack.c.bf16 %v1225_v42, %v1223_v2 }
 0x29e   : > { %1305 = vmatmul.bf16.vlgmr.msrb.gmra.mxu1 %v1276_v60  ;;  %1316 = vmatpush.bf16.msra.mxu2 %v1260_v22 }
 0x29f   : > { %1355 = vmatpush.bf16.msra.mxu1 %v1261_v31  ;;  %1344 = vmatmul.bf16.vlgmr.msrb.gmra.mxu0 %v1276_v60 }
 0x2a0   : > { %v1203_v35 = vpop.permute.xlu1 %1202  ;;  %v1197_v5 = vpop.permute.xlu0 %1196 }
 0x2a1   : > { %v1210_v46 = vsel %vm507_vm0, %v2701_v61, %v1203_v35  ;;  %v1214_v49 = vsel %vm507_vm0, %v1203_v35, %v2701_v61  ;;  %v1211_v52 = vsel %vm507_vm0, %v1197_v5, %v1205_v3  ;;  %v1215_v54 = vsel %vm507_vm0, %v1205_v3, %v1197_v5 }
 0x2a2   : > { %v1218_v55 = vmul.f32 %v1640_v13, %v1210_v46  ;;  %v1219_v27 = vmul.f32 %v1641_v48, %v1214_v49  ;;  %v1220_v50 = vmul.f32 %v1640_v13, %v1211_v52  ;;  %v1221_v10 = vmul.f32 %v1641_v48, %v1215_v54 }
 0x2a4   : > { %v1258_v24 = vpack.c.bf16 %v1220_v50, %v1218_v55  ;;  %v1259_v43 = vpack.c.bf16 %v1221_v10, %v1219_v27 }
 0x2a6   : > { %1317 = vmatpush.bf16.msra.mxu2 %v1258_v24  ;;  %1356 = vmatpush.bf16.msra.mxu1 %v1259_v43 }
 0x2a8   : > { %v1268_v25 = vpop.permute.xlu0 %1267 }
 0x2a9   : > { %1519 = vmatmul.msk.bf16.vlgmr.msra.gmra.mxu2 %vm1280_vm1, %v1277_v36 }
 0x2ae   : > { %1520 = vmatmul.msk.bf16.vlgmr.msra.gmra.mxu1 %vm1280_vm1, %v1277_v36 }
 0x31b   : > { %v1306_v61 = vpop.f32.mrf.mxu1 }
 0x31c   : > { %v1293_v34 = vpop.f32.mrf.mxu2  ;;  %v1345_v23 = vpop.f32.mrf.mxu0 }
 0x31d   : > { %v1332_v37 = vpop.f32.mrf.mxu3  ;;  %v1294_v14 = vadd.f32 %v1293_v34, %v1268_v25 }
 0x31e   : > { %v1333_v11 = vadd.f32 %v1332_v37, %v1268_v25 }
 0x31f   : > { %v1307_v12 = vadd.f32 %v1306_v61, %v1294_v14 }
 0x320   : > { %v1346_v15 = vadd.f32 %v1345_v23, %v1333_v11 }
 0x323   : > { %v1308_v9 = vpop.f32.mrf.mxu1 }
 0x324   : > { %v1295_v4 = vpop.f32.mrf.mxu2  ;;  %v1347_v47 = vpop.f32.mrf.mxu0 }
 0x325   : > { %v1334_v30 = vpop.f32.mrf.mxu3 }
 0x32b   : > { %v1358_v29 = vpop.f32.mrf.mxu1 }
 0x32c   : > { %v1359_v28 = vadd.f32 %v1358_v29, %v1346_v15  ;;  %v1319_v44 = vpop.f32.mrf.mxu2 }
 0x32d   : > { %v1320_v56 = vadd.f32 %v1319_v44, %v1307_v12 }
 0x32e   : > { %1363 = vst [vmem:[%s400_s18 + $0x8] sm:$0x1f] %v1359_v28 }
 0x32f   : > { %1362 = vst [vmem:[%s400_s18] sm:$0x1f] %v1320_v56 }
 0x330   : > { %1729 = shalt.err (!%p1726_p9)
}
 0x331   : > { %1540 = dma.vmem_to_hbm [thread:$0]  (%p1880_p5), %s1379_s27, 256, %s1381_s22, %s1365_s17  }
 0x333   : > { %v1360_v53 = vpop.f32.mrf.mxu1 }
 0x334   : > { %v1321_v45 = vpop.f32.mrf.mxu2 }
 0x335 PF: > { %p1557_p10 = scmp.ge.s32.totalorder %s1772_s16, 2  ;;  %s1392_s21 = sand.u32 1, %s1760_s13  }
 0x336   : > { %s1393_s26 = scalar_lea.sflag [#allocation4], %s1392_s21 }
 0x337   : > { %p1550_p11 = pnand %p1557_p10, %p1884_p6 }
 0x339   : > { %p1551_p12 = pneg %p1550_p11 }
 0x33b   : > { %1755 = dma.done.wait (%p1551_p12), %s1393_s26, 256  }
 0x33c   : > { %1757 = vsyncadd (%p1551_p12), %s1393_s26, 4294967040  ;;  %s2876_s18 = sld [smem:[#allocation11_spill]]  ;;  %p22_p5 = scmp.ge.s32.totalorder %s1867_s19, 4  }
 0x33d   : > { %s2877_s13 = smov %s1764_s14  ;;  %s2878_s14 = smov %s1768_s15 }
 0x33e   : > { %s2880_s16 = smov %s1867_s19  ;;  %24 = sbr.rel (!%p22_p5) target bundleno = 5 (0x5), region = 107 }
 0x342   : > { %s2879_s15 = smov %s2876_s18 }
 0x343   :  { %1399 = vsyncpa [#allocation3], 1 }
 0x344   :  { %1401 = vsyncpa [#allocation3 + $0x1], 1 }
 0x345   :  { %1402 = vsyncpa [#allocation6], 1 }
 0x346   :  { %1403 = vsyncpa [#allocation4], 1 }
 0x347   :  { %1405 = vsyncpa [#allocation4 + $0x1], 1 }

</bundles_post_ra>
